<compile_context>
chip_gen: v5e
topology: v5e:2x2
jax: 0.10.0
libtpu: 0.0.40
codegen_flags: <defaults>
</compile_context>

<pallas_src>
import functools

import jax
import jax.numpy as jnp
from jax.experimental import pallas as pl
from jax.experimental.pallas import tpu as pltpu


def _round_up(x, m):
    return (x + m - 1) // m * m


def _mlp_kernel(x_ref, w1_ref, b1_ref, w2_ref, b2_ref, o_ref):
    # x_ref:  (tm, Cp)     tile of tokens (lane-dense, Cp % 128 == 0)
    # w1_ref: (Cp, Hp)     full fc1 weight (resident in VMEM)
    # b1_ref: (1, Hp)      fc1 bias
    # w2_ref: (Hp, Op)     full fc2 weight
    # b2_ref: (1, Op)      fc2 bias
    # o_ref:  (tm, Op)
    x = x_ref[...]                      # native dtype -> MXU fast path

    # fc1 (f32 accumulation on the MXU)
    h = jnp.dot(x, w1_ref[...], preferred_element_type=jnp.float32)
    h = h + b1_ref[...].astype(jnp.float32)

    # exact GELU (matches torch.nn.GELU default): 0.5*x*(1+erf(x/sqrt(2)))
    inv_sqrt2 = jnp.float32(0.7071067811865476)
    h = 0.5 * h * (1.0 + jax.lax.erf(h * inv_sqrt2))

    # drop1: p=0.0 -> identity

    # fc2: cast activation back to weight dtype so bf16 weights stay bf16.
    h = h.astype(w2_ref.dtype)
    y = jnp.dot(h, w2_ref[...], preferred_element_type=jnp.float32)
    y = y + b2_ref[...].astype(jnp.float32)

    # drop2: p=0.0 -> identity
    o_ref[...] = y.astype(o_ref.dtype)


@functools.partial(jax.jit, static_argnames=("tm",))
def mlp_forward(x, w1, b1, w2, b2, *, tm=256):
    """x: (B, N, C_in) -> (B, N, C_out)."""
    B, N, C_in = x.shape
    H = w1.shape[1]
    C_out = w2.shape[1]
    tokens = B * N

    # Lane-dense padding: every last dim a multiple of 128.
    Cp = _round_up(C_in, 128)
    Hp = _round_up(H, 128)
    Op = _round_up(C_out, 128)
    # Token padding: multiple of the tile (no divisibility assert).
    Tp = _round_up(tokens, tm)

    itemsize = jnp.dtype(x.dtype).itemsize

    x2d = x.reshape(tokens, C_in)
    x2d = jnp.pad(x2d, ((0, Tp - tokens), (0, Cp - C_in)))
    w1p = jnp.pad(w1, ((0, Cp - C_in), (0, Hp - H)))
    b1p = jnp.pad(b1, (0, Hp - H)).reshape(1, Hp)
    w2p = jnp.pad(w2, ((0, Hp - H), (0, Op - C_out)))
    b2p = jnp.pad(b2, (0, Op - C_out)).reshape(1, Op)

    grid = (Tp // tm,)

    cost = pl.CostEstimate(
        flops=2 * Tp * (Cp * Hp + Hp * Op),
        transcendentals=Tp * Hp,                      # erf per hidden element
        bytes_accessed=(Tp * Cp + Cp * Hp + Hp + Hp * Op + Op + Tp * Op)
        * itemsize,
    )

    out2d = pl.pallas_call(
        _mlp_kernel,
        out_shape=jax.ShapeDtypeStruct((Tp, Op), x.dtype),
        grid_spec=pltpu.PrefetchScalarGridSpec(
            num_scalar_prefetch=0,
            grid=grid,
            in_specs=[
                # token tile of the input
                pl.BlockSpec((tm, Cp), lambda i: (i, 0)),
                # full weights / biases, same block for every grid step
                pl.BlockSpec((Cp, Hp), lambda i: (0, 0)),
                pl.BlockSpec((1, Hp), lambda i: (0, 0)),
                pl.BlockSpec((Hp, Op), lambda i: (0, 0)),
                pl.BlockSpec((1, Op), lambda i: (0, 0)),
            ],
            out_specs=pl.BlockSpec((tm, Op), lambda i: (i, 0)),
        ),
        compiler_params=pltpu.CompilerParams(
            dimension_semantics=("parallel",),
            vmem_limit_bytes=64 * 1024 * 1024,
        ),
        cost_estimate=cost,
    )(x2d, w1p, b1p, w2p, b2p)

    return out2d[:tokens, :C_out].reshape(B, N, C_out)


def _reference_mlp(x, w1, b1, w2, b2):
    h = jnp.einsum("bnc,ch->bnh", x, w1) + b1
    h = 0.5 * h * (1.0 + jax.lax.erf(h * jnp.float32(0.7071067811865476)))
    y = jnp.einsum("bnh,ho->bno", h, w2) + b2
    return y


if __name__ == "__main__":
    # Small shapes consistent with a ViT-style MLP block.
    B, N = 2, 8            # batch, sequence (tokens)
    C_in = 32              # in_features
    H = 64                 # hidden_features
    C_out = 32             # out_features (defaults to in_features)

    key = jax.random.PRNGKey(0)
    k_x, k_w1, k_b1, k_w2, k_b2 = jax.random.split(key, 5)

    x = jax.random.normal(k_x, (B, N, C_in), dtype=jnp.float32)
    # Deterministic synthetic parameters (nn.Linear-ish scale).
    w1 = jax.random.uniform(k_w1, (C_in, H), jnp.float32,
                            -1.0 / jnp.sqrt(C_in), 1.0 / jnp.sqrt(C_in))
    b1 = jax.random.uniform(k_b1, (H,), jnp.float32,
                            -1.0 / jnp.sqrt(C_in), 1.0 / jnp.sqrt(C_in))
    w2 = jax.random.uniform(k_w2, (H, C_out), jnp.float32,
                            -1.0 / jnp.sqrt(H), 1.0 / jnp.sqrt(H))
    b2 = jax.random.uniform(k_b2, (C_out,), jnp.float32,
                            -1.0 / jnp.sqrt(H), 1.0 / jnp.sqrt(H))

    out = mlp_forward(x, w1, b1, w2, b2, tm=256)
    out = jax.block_until_ready(out)

    ref = _reference_mlp(x, w1, b1, w2, b2)
    assert out.shape == (B, N, C_out)
    assert jnp.allclose(out, ref, atol=1e-4, rtol=1e-4), "mismatch vs reference"

    print("KERNEL_OK")
</pallas_src>

<mosaic_0001>
module attributes {stable_mosaic.version = 11 : i64} {
  func.func @_mlp_kernel(%arg0: i32, %arg1: memref<256x128xf32, #tpu.memory_space<vmem>>, %arg2: memref<128x128xf32, #tpu.memory_space<vmem>>, %arg3: memref<1x128xf32, #tpu.memory_space<vmem>>, %arg4: memref<128x128xf32, #tpu.memory_space<vmem>>, %arg5: memref<1x128xf32, #tpu.memory_space<vmem>>, %arg6: memref<256x128xf32, #tpu.memory_space<vmem>>) attributes {dimension_semantics = [#tpu.dimension_semantics<parallel>], iteration_bounds = array<i64: 1>, scalar_prefetch = 0 : i64, scratch_operands = 0 : i64, tpu.core_type = #tpu.core_type<tc>, window_params = [{transform_indices = @transform_0, window_bounds = array<i64: 256, 128>}, {pipeline_mode = #tpu.pipeline_mode<synchronous>, transform_indices = @transform_1, window_bounds = array<i64: 128, 128>}, {pipeline_mode = #tpu.pipeline_mode<synchronous>, transform_indices = @transform_2, window_bounds = array<i64: 1, 128>}, {pipeline_mode = #tpu.pipeline_mode<synchronous>, transform_indices = @transform_3, window_bounds = array<i64: 128, 128>}, {pipeline_mode = #tpu.pipeline_mode<synchronous>, transform_indices = @transform_4, window_bounds = array<i64: 1, 128>}, {transform_indices = @transform_5, window_bounds = array<i64: 256, 128>}]} {
    %c0 = arith.constant 0 : index
    %c0_0 = arith.constant 0 : index
    %0 = vector.load %arg1[%c0, %c0_0] : memref<256x128xf32, #tpu.memory_space<vmem>>, vector<256x128xf32>
    %c0_1 = arith.constant 0 : index
    %c0_2 = arith.constant 0 : index
    %1 = vector.load %arg2[%c0_1, %c0_2] : memref<128x128xf32, #tpu.memory_space<vmem>>, vector<128x128xf32>
    %cst = arith.constant dense<0.000000e+00> : vector<256x128xf32>
    %2 = tpu.matmul %0, %1, %cst {dimension_numbers = #tpu.dot_dimension_numbers<[1], [0], [0], [1], [0, 0, 1, 1], [], []>} : vector<256x128xf32>, vector<128x128xf32>, vector<256x128xf32> -> vector<256x128xf32>
    %c0_3 = arith.constant 0 : index
    %c0_4 = arith.constant 0 : index
    %3 = vector.load %arg3[%c0_3, %c0_4] : memref<1x128xf32, #tpu.memory_space<vmem>>, vector<1x128xf32>
    %4 = vector.broadcast %3 : vector<1x128xf32> to vector<256x128xf32>
    %5 = arith.addf %2, %4 : vector<256x128xf32>
    %cst_5 = arith.constant 5.000000e-01 : f32
    %6 = vector.broadcast %cst_5 : f32 to vector<256x128xf32>
    %7 = arith.mulf %6, %5 : vector<256x128xf32>
    %cst_6 = arith.constant 0.707106769 : f32
    %8 = vector.broadcast %cst_6 : f32 to vector<256x128xf32>
    %9 = arith.mulf %5, %8 : vector<256x128xf32>
    %10 = math.erf %9 : vector<256x128xf32>
    %cst_7 = arith.constant 1.000000e+00 : f32
    %11 = vector.broadcast %cst_7 : f32 to vector<256x128xf32>
    %12 = arith.addf %11, %10 : vector<256x128xf32>
    %13 = arith.mulf %7, %12 : vector<256x128xf32>
    %c0_8 = arith.constant 0 : index
    %c0_9 = arith.constant 0 : index
    %14 = vector.load %arg4[%c0_8, %c0_9] : memref<128x128xf32, #tpu.memory_space<vmem>>, vector<128x128xf32>
    %cst_10 = arith.constant dense<0.000000e+00> : vector<256x128xf32>
    %15 = tpu.matmul %13, %14, %cst_10 {dimension_numbers = #tpu.dot_dimension_numbers<[1], [0], [0], [1], [0, 0, 1, 1], [], []>} : vector<256x128xf32>, vector<128x128xf32>, vector<256x128xf32> -> vector<256x128xf32>
    %c0_11 = arith.constant 0 : index
    %c0_12 = arith.constant 0 : index
    %16 = vector.load %arg5[%c0_11, %c0_12] : memref<1x128xf32, #tpu.memory_space<vmem>>, vector<1x128xf32>
    %17 = vector.broadcast %16 : vector<1x128xf32> to vector<256x128xf32>
    %18 = arith.addf %15, %17 : vector<256x128xf32>
    %c0_13 = arith.constant 0 : index
    %c0_14 = arith.constant 0 : index
    %19 = vector.load %arg6[%c0_13, %c0_14] : memref<256x128xf32, #tpu.memory_space<vmem>>, vector<256x128xf32>
    tpu.vector_store %arg6[%c0_13, %c0_14], %18 {strides = array<i32>} : memref<256x128xf32, #tpu.memory_space<vmem>>, vector<256x128xf32>,
    return
  }
  func.func @transform_0(%arg0: i32) -> (i32, i32) {
    %c0_i32 = arith.constant 0 : i32
    %c0_i32_0 = arith.constant 0 : i32
    return %arg0, %c0_i32 : i32, i32
  }
  func.func @transform_1(%arg0: i32) -> (i32, i32) {
    %c0_i32 = arith.constant 0 : i32
    %c0_i32_0 = arith.constant 0 : i32
    %c0_i32_1 = arith.constant 0 : i32
    return %c0_i32, %c0_i32_0 : i32, i32
  }
  func.func @transform_2(%arg0: i32) -> (i32, i32) {
    %c0_i32 = arith.constant 0 : i32
    %c0_i32_0 = arith.constant 0 : i32
    %c0_i32_1 = arith.constant 0 : i32
    return %c0_i32, %c0_i32_0 : i32, i32
  }
  func.func @transform_3(%arg0: i32) -> (i32, i32) {
    %c0_i32 = arith.constant 0 : i32
    %c0_i32_0 = arith.constant 0 : i32
    %c0_i32_1 = arith.constant 0 : i32
    return %c0_i32, %c0_i32_0 : i32, i32
  }
  func.func @transform_4(%arg0: i32) -> (i32, i32) {
    %c0_i32 = arith.constant 0 : i32
    %c0_i32_0 = arith.constant 0 : i32
    %c0_i32_1 = arith.constant 0 : i32
    return %c0_i32, %c0_i32_0 : i32, i32
  }
  func.func @transform_5(%arg0: i32) -> (i32, i32) {
    %c0_i32 = arith.constant 0 : i32
    %c0_i32_0 = arith.constant 0 : i32
    return %arg0, %c0_i32 : i32, i32
  }
}

</mosaic_0001>

<bundles_post_ra>
// kernel: mlp_forward.1
= control target key start
LH: loop header
LB: loop body
LE: loop exit
PB: predicated region body
PF: predicated region fallthrough
CT: control target
= control target key end

     0   :  { %s3526_s1 = inlined_call_operand.vmem [shape: f32[128,128], index: 1, kind: input, shape index: {}]   ;;  %s3527_s2 = inlined_call_operand.vmem [shape: f32[1,128], index: 2, kind: input, shape index: {}]   ;;  %s3528_s0 = inlined_call_operand.vmem [shape: f32[256,128], index: 0, kind: input, shape index: {}]   ;;  %s3529_s3 = inlined_call_operand.vmem [shape: f32[128,128], index: 3, kind: input, shape index: {}]   ;;  %s3530_s4 = inlined_call_operand.vmem [shape: f32[1,128], index: 4, kind: input, shape index: {}]   ;;  %s3531_s5 = inlined_call_operand.vmem [shape: f32[256,128], index: 5, kind: output, shape index: {}]  }
   0x1   :  { %v67_v0 = vld [vmem:[%s3526_s1 + $0x78] sm:$0xff]  ;;  %v66_v1 = vld [vmem:[%s3526_s1 + $0x70] sm:$0xff]  ;;  %v65_v2 = vld [vmem:[%s3526_s1 + $0x68] sm:$0xff] }
   0x2   :  { %72 = vmatpush.msra.mxu0 %v67_v0  ;;  %1794 = vmatpush.msra.mxu2 %v67_v0  ;;  %v64_v3 = vld [vmem:[%s3526_s1 + $0x60] sm:$0xff]  ;;  %v63_v4 = vld [vmem:[%s3526_s1 + $0x58] sm:$0xff]  ;;  %v62_v5 = vld [vmem:[%s3526_s1 + $0x50] sm:$0xff] }
   0x3   :  { %v61_v6 = vld [vmem:[%s3526_s1 + $0x48] sm:$0xff]  ;;  %v60_v7 = vld [vmem:[%s3526_s1 + $0x40] sm:$0xff]  ;;  %v59_v8 = vld [vmem:[%s3526_s1 + $0x38] sm:$0xff] }
   0x4   :  { %73 = vmatpush.msra.mxu0 %v66_v1  ;;  %1795 = vmatpush.msra.mxu2 %v66_v1  ;;  %v58_v9 = vld [vmem:[%s3526_s1 + $0x30] sm:$0xff]  ;;  %v57_v10 = vld [vmem:[%s3526_s1 + $0x28] sm:$0xff]  ;;  %v56_v11 = vld [vmem:[%s3526_s1 + $0x20] sm:$0xff] }
   0x5   :  { %v55_v12 = vld [vmem:[%s3526_s1 + $0x18] sm:$0xff]  ;;  %v54_v13 = vld [vmem:[%s3526_s1 + $0x10] sm:$0xff]  ;;  %v53_v14 = vld [vmem:[%s3526_s1 + $0x8] sm:$0xff] }
   0x6   :  { %74 = vmatpush.msra.mxu0 %v65_v2  ;;  %1796 = vmatpush.msra.mxu2 %v65_v2  ;;  %v52_v15 = vld [vmem:[%s3526_s1] sm:$0xff]  ;;  %v21_v18 = vld [vmem:[%s3528_s0 + $0x8] sm:$0xff]  ;;  %v22_v20 = vld [vmem:[%s3528_s0 + $0x10] sm:$0xff] }
   0x7   :  { %v20_v16 = vld [vmem:[%s3528_s0] sm:$0xff]  ;;  %v37_v19 = vld [vmem:[%s3528_s0 + $0x88] sm:$0xff]  ;;  %v38_v21 = vld [vmem:[%s3528_s0 + $0x90] sm:$0xff] }
   0x8   :  { %75 = vmatpush.msra.mxu0 %v64_v3  ;;  %1797 = vmatpush.msra.mxu2 %v64_v3  ;;  %v36_v17 = vld [vmem:[%s3528_s0 + $0x80] sm:$0xff]  ;;  %v23_v22 = vld [vmem:[%s3528_s0 + $0x18] sm:$0xff]  ;;  %v25_v26 = vld [vmem:[%s3528_s0 + $0x28] sm:$0xff] }
   0x9   :  { %v39_v23 = vld [vmem:[%s3528_s0 + $0x98] sm:$0xff]  ;;  %v24_v24 = vld [vmem:[%s3528_s0 + $0x20] sm:$0xff]  ;;  %v41_v27 = vld [vmem:[%s3528_s0 + $0xa8] sm:$0xff] }
   0xa   :  { %76 = vmatpush.msra.mxu0 %v63_v4  ;;  %1798 = vmatpush.msra.mxu2 %v63_v4  ;;  %v40_v25 = vld [vmem:[%s3528_s0 + $0xa0] sm:$0xff]  ;;  %v26_v28 = vld [vmem:[%s3528_s0 + $0x30] sm:$0xff]  ;;  %v27_v30 = vld [vmem:[%s3528_s0 + $0x38] sm:$0xff] }
   0xb   :  { %v42_v29 = vld [vmem:[%s3528_s0 + $0xb0] sm:$0xff]  ;;  %v43_v31 = vld [vmem:[%s3528_s0 + $0xb8] sm:$0xff]  ;;  %v28_v32 = vld [vmem:[%s3528_s0 + $0x40] sm:$0xff] }
   0xc   :  { %77 = vmatpush.msra.mxu0 %v62_v5  ;;  %1799 = vmatpush.msra.mxu2 %v62_v5  ;;  %v44_v33 = vld [vmem:[%s3528_s0 + $0xc0] sm:$0xff]  ;;  %v29_v34 = vld [vmem:[%s3528_s0 + $0x48] sm:$0xff]  ;;  %v30_v36 = vld [vmem:[%s3528_s0 + $0x50] sm:$0xff] }
   0xd   :  { %v45_v35 = vld [vmem:[%s3528_s0 + $0xc8] sm:$0xff]  ;;  %v46_v37 = vld [vmem:[%s3528_s0 + $0xd0] sm:$0xff]  ;;  %v31_v38 = vld [vmem:[%s3528_s0 + $0x58] sm:$0xff] }
   0xe   :  { %78 = vmatpush.msra.mxu0 %v61_v6  ;;  %1800 = vmatpush.msra.mxu2 %v61_v6  ;;  %v47_v39 = vld [vmem:[%s3528_s0 + $0xd8] sm:$0xff]  ;;  %v32_v40 = vld [vmem:[%s3528_s0 + $0x60] sm:$0xff]  ;;  %v33_v42 = vld [vmem:[%s3528_s0 + $0x68] sm:$0xff] }
   0xf   :  { %v48_v41 = vld [vmem:[%s3528_s0 + $0xe0] sm:$0xff]  ;;  %v49_v43 = vld [vmem:[%s3528_s0 + $0xe8] sm:$0xff]  ;;  %v34_v44 = vld [vmem:[%s3528_s0 + $0x70] sm:$0xff] }
  0x10   :  { %79 = vmatpush.msra.mxu0 %v60_v7  ;;  %1801 = vmatpush.msra.mxu2 %v60_v7  ;;  %v50_v45 = vld [vmem:[%s3528_s0 + $0xf0] sm:$0xff]  ;;  %v1608_v46 = vld [vmem:[%s3529_s3 + $0x78] sm:$0xff]  ;;  %v1606_v50 = vld [vmem:[%s3529_s3 + $0x68] sm:$0xff] }
  0x11   :  { %v35_v47 = vld [vmem:[%s3528_s0 + $0x78] sm:$0xff]  ;;  %1613 = vmatpush.msra.mxu1 %v1608_v46  ;;  %1810 = vmatpush.msra.mxu3 %v1608_v46  ;;  %v1607_v49 = vld [vmem:[%s3529_s3 + $0x70] sm:$0xff]  ;;  %v2079_v51 = vld [vmem:[%s3527_s2] ss:$0 sm:$0xff] }
  0x12   :  { %80 = vmatpush.msra.mxu0 %v59_v8  ;;  %1802 = vmatpush.msra.mxu2 %v59_v8  ;;  %v51_v48 = vld [vmem:[%s3528_s0 + $0xf8] sm:$0xff]  ;;  %v1605_v52 = vld [vmem:[%s3529_s3 + $0x60] sm:$0xff]  ;;  %v1603_v56 = vld [vmem:[%s3529_s3 + $0x50] sm:$0xff] }
  0x13   :  { %1614 = vmatpush.msra.mxu1 %v1607_v49  ;;  %1811 = vmatpush.msra.mxu3 %v1607_v49  ;;  %v1604_v54 = vld [vmem:[%s3529_s3 + $0x58] sm:$0xff]  ;;  %v1602_v58 = vld [vmem:[%s3529_s3 + $0x48] sm:$0xff]  ;;  %v1601_v61 = vld [vmem:[%s3529_s3 + $0x40] sm:$0xff] }
  0x14   :  { %81 = vmatpush.msra.mxu0 %v58_v9  ;;  %1803 = vmatpush.msra.mxu2 %v58_v9  ;;  %v1600_v1 = vld [vmem:[%s3529_s3 + $0x38] sm:$0xff]  ;;  %v1599_v7 = vld [vmem:[%s3529_s3 + $0x30] sm:$0xff] }
  0x15   :  { %1615 = vmatpush.msra.mxu1 %v1606_v50  ;;  %1812 = vmatpush.msra.mxu3 %v1606_v50 }
  0x16   :  { %82 = vmatpush.msra.mxu0 %v57_v10  ;;  %1804 = vmatpush.msra.mxu2 %v57_v10 }
  0x17   :  { %1616 = vmatpush.msra.mxu1 %v1605_v52  ;;  %1813 = vmatpush.msra.mxu3 %v1605_v52 }
  0x18   :  { %83 = vmatpush.msra.mxu0 %v56_v11  ;;  %1805 = vmatpush.msra.mxu2 %v56_v11  ;;  %v1598_v11 = vld [vmem:[%s3529_s3 + $0x28] sm:$0xff] }
  0x19   :  { %1617 = vmatpush.msra.mxu1 %v1604_v54  ;;  %1814 = vmatpush.msra.mxu3 %v1604_v54 }
  0x1a   :  { %84 = vmatpush.msra.mxu0 %v55_v12  ;;  %1806 = vmatpush.msra.mxu2 %v55_v12 }
  0x1b   :  { %1618 = vmatpush.msra.mxu1 %v1603_v56  ;;  %1815 = vmatpush.msra.mxu3 %v1603_v56 }
  0x1c   :  { %85 = vmatpush.msra.mxu0 %v54_v13  ;;  %1807 = vmatpush.msra.mxu2 %v54_v13 }
  0x1d   :  { %1619 = vmatpush.msra.mxu1 %v1602_v58  ;;  %1816 = vmatpush.msra.mxu3 %v1602_v58 }
  0x1e   :  { %86 = vmatpush.msra.mxu0 %v53_v14  ;;  %1808 = vmatpush.msra.mxu2 %v53_v14 }
  0x1f   :  { %1620 = vmatpush.msra.mxu1 %v1601_v61  ;;  %1817 = vmatpush.msra.mxu3 %v1601_v61 }
  0x20   :  { %87 = vmatpush.msra.mxu0 %v52_v15  ;;  %1809 = vmatpush.msra.mxu2 %v52_v15 }
  0x21   :  { %88 = vmatmul.f32.vlgmr.msra.gmra.mxu0 %v20_v16  ;;  %136 = vmatmul.f32.vlgmr.msra.gmra.mxu2 %v36_v17  ;;  %v1597_v16 = vld [vmem:[%s3529_s3 + $0x20] sm:$0xff] }
  0x22   :  { %1621 = vmatpush.msra.mxu1 %v1600_v1  ;;  %1818 = vmatpush.msra.mxu3 %v1600_v1 }
  0x24   :  { %1622 = vmatpush.msra.mxu1 %v1599_v7  ;;  %1819 = vmatpush.msra.mxu3 %v1599_v7 }
  0x26   :  { %1623 = vmatpush.msra.mxu1 %v1598_v11  ;;  %1820 = vmatpush.msra.mxu3 %v1598_v11 }
  0x28   :  { %1624 = vmatpush.msra.mxu1 %v1597_v16  ;;  %1821 = vmatpush.msra.mxu3 %v1597_v16 }
  0x29   :  { %91 = vmatmul.f32.gmra.mxu0 %v21_v18  ;;  %139 = vmatmul.f32.gmra.mxu2 %v37_v19 }
  0x31   :  { %94 = vmatmul.f32.gmra.mxu0 %v22_v20  ;;  %142 = vmatmul.f32.gmra.mxu2 %v38_v21  ;;  %v1596_v21 = vld [vmem:[%s3529_s3 + $0x18] sm:$0xff] }
  0x32   :  { %1625 = vmatpush.msra.mxu1 %v1596_v21  ;;  %1822 = vmatpush.msra.mxu3 %v1596_v21 }
  0x39   :  { %97 = vmatmul.f32.gmra.mxu0 %v23_v22  ;;  %145 = vmatmul.f32.gmra.mxu2 %v39_v23 }
  0x41   :  { %100 = vmatmul.f32.gmra.mxu0 %v24_v24  ;;  %148 = vmatmul.f32.gmra.mxu2 %v40_v25 }
  0x49   :  { %103 = vmatmul.f32.gmra.mxu0 %v25_v26  ;;  %151 = vmatmul.f32.gmra.mxu2 %v41_v27  ;;  %v1595_v26 = vld [vmem:[%s3529_s3 + $0x10] sm:$0xff] }
  0x4a   :  { %1626 = vmatpush.msra.mxu1 %v1595_v26  ;;  %1823 = vmatpush.msra.mxu3 %v1595_v26 }
  0x51   :  { %106 = vmatmul.f32.gmra.mxu0 %v26_v28  ;;  %154 = vmatmul.f32.gmra.mxu2 %v42_v29 }
  0x59   :  { %109 = vmatmul.f32.gmra.mxu0 %v27_v30  ;;  %157 = vmatmul.f32.gmra.mxu2 %v43_v31  ;;  %v1594_v31 = vld [vmem:[%s3529_s3 + $0x8] sm:$0xff] }
  0x5a   :  { %1627 = vmatpush.msra.mxu1 %v1594_v31  ;;  %1824 = vmatpush.msra.mxu3 %v1594_v31 }
  0x61   :  { %112 = vmatmul.f32.gmra.mxu0 %v28_v32  ;;  %160 = vmatmul.f32.gmra.mxu2 %v44_v33 }
  0x69   :  { %115 = vmatmul.f32.gmra.mxu0 %v29_v34  ;;  %163 = vmatmul.f32.gmra.mxu2 %v45_v35 }
  0x71   :  { %118 = vmatmul.f32.gmra.mxu0 %v30_v36  ;;  %166 = vmatmul.f32.gmra.mxu2 %v46_v37 }
  0x79   :  { %121 = vmatmul.f32.gmra.mxu0 %v31_v38  ;;  %169 = vmatmul.f32.gmra.mxu2 %v47_v39  ;;  %v1593_v38 = vld [vmem:[%s3529_s3] sm:$0xff] }
  0x7a   :  { %1628 = vmatpush.msra.mxu1 %v1593_v38  ;;  %1825 = vmatpush.msra.mxu3 %v1593_v38 }
  0x81   :  { %124 = vmatmul.f32.gmra.mxu0 %v32_v40  ;;  %172 = vmatmul.f32.gmra.mxu2 %v48_v41 }
  0x89   :  { %127 = vmatmul.f32.gmra.mxu0 %v33_v42  ;;  %175 = vmatmul.f32.gmra.mxu2 %v49_v43 }
  0x91   :  { %130 = vmatmul.f32.gmra.mxu0 %v34_v44  ;;  %178 = vmatmul.f32.gmra.mxu2 %v50_v45 }
  0x99   :  { %133 = vmatmul.f32.gmra.mxu0 %v35_v47  ;;  %181 = vmatmul.f32.gmra.mxu2 %v51_v48 }
  0x9e   :  { %v89_v53 = vpop.f32.mrf.mxu0 }
  0x9f   :  { %v2088_v55 = vadd.f32 %v2079_v51, %v89_v53 }
  0xa1   :  { %v2094_v57 = vmul.f32 0.70710677, %v2088_v55 }
  0xa3   :  { %v249_v59 = vmul.f32 %v2094_v57, %v2094_v57 }
  0xa4   :  { %v137_v60 = vpop.f32.mrf.mxu2 }
  0xa5   :  { %v2104_v62 = vmin.f32 %v249_v59, 16.0  ;;  %v2107_v63 = vadd.f32 %v2079_v51, %v137_v60 }
  0xa6   :  { %v92_v0 = vpop.f32.mrf.mxu0 }
  0xa7   :  { %v2113_v2 = vmul.f32 0.70710677, %v2107_v63  ;;  %v2116_v3 = vadd.f32 %v2079_v51, %v92_v0  ;;  %v262_v4 = vmul.f32 3.8918573e-05, %v2104_v62  ;;  %v251_v14 = vmul.f32 2.1237322e-06, %v2104_v62 }
  0xa9   :  { %v889_v5 = vmul.f32 %v2113_v2, %v2113_v2  ;;  %v2122_v6 = vmul.f32 0.70710677, %v2116_v3  ;;  %v263_v8 = vadd.f32 0.001143296, %v262_v4  ;;  %v252_v25 = vadd.f32 0.00028619796, %v251_v14 }
  0xab   :  { %v2127_v9 = vmin.f32 %v889_v5, 16.0  ;;  %v289_v10 = vmul.f32 %v2122_v6, %v2122_v6  ;;  %v264_v13 = vmul.f32 %v263_v8, %v2104_v62  ;;  %v253_v36 = vmul.f32 %v252_v25, %v2104_v62 }
  0xac   :  { %v140_v12 = vpop.f32.mrf.mxu2 }
  0xad   :  { %v2137_v15 = vadd.f32 %v2079_v51, %v140_v12  ;;  %v891_v17 = vmul.f32 2.1237322e-06, %v2127_v9  ;;  %v2143_v18 = vmin.f32 %v289_v10, 16.0  ;;  %v265_v20 = vadd.f32 0.014752088, %v264_v13 }
  0xae   :  { %v95_v19 = vpop.f32.mrf.mxu0  ;;  %v254_v49 = vadd.f32 0.0036580483, %v253_v36 }
  0xaf   :  { %v2149_v22 = vmul.f32 0.70710677, %v2137_v15  ;;  %v2152_v23 = vadd.f32 %v2079_v51, %v95_v19  ;;  %v266_v24 = vmul.f32 %v265_v20, %v2104_v62  ;;  %v892_v27 = vadd.f32 0.00028619796, %v891_v17 }
  0xb0   :  { %v291_v28 = vmul.f32 2.1237322e-06, %v2143_v18  ;;  %v255_v4 = vmul.f32 %v254_v49, %v2104_v62  ;;  %v2246_v49 = vmul.f32 0.5, %v2107_v63 }
  0xb1   :  { %v929_v29 = vmul.f32 %v2149_v22, %v2149_v22  ;;  %v2162_v30 = vmul.f32 0.70710677, %v2152_v23  ;;  %v267_v32 = vadd.f32 0.112945676, %v266_v24  ;;  %v893_v39 = vmul.f32 %v892_v27, %v2127_v9 }
  0xb2   :  { %v292_v40 = vadd.f32 0.00028619796, %v291_v28  ;;  %v256_v19 = vadd.f32 0.05243302, %v255_v4 }
  0xb3   :  { %v2167_v33 = vmin.f32 %v929_v29, 16.0  ;;  %v329_v34 = vmul.f32 %v2162_v30, %v2162_v30  ;;  %v268_v44 = vmul.f32 %v267_v32, %v2104_v62  ;;  %v894_v50 = vadd.f32 0.0036580483, %v893_v39 }
  0xb4   :  { %v143_v35 = vpop.f32.mrf.mxu2  ;;  %v293_v52 = vmul.f32 %v292_v40, %v2143_v18  ;;  %v257_v36 = vmul.f32 %v256_v19, %v2104_v62 }
  0xb5   :  { %v2173_v37 = vadd.f32 %v2079_v51, %v143_v35  ;;  %v931_v41 = vmul.f32 2.1237322e-06, %v2167_v33  ;;  %v2180_v42 = vmin.f32 %v329_v34, 16.0  ;;  %v269_v58 = vadd.f32 0.4994258, %v268_v44 }
  0xb6   :  { %v98_v43 = vpop.f32.mrf.mxu0  ;;  %v895_v5 = vmul.f32 %v894_v50, %v2127_v9  ;;  %v294_v7 = vadd.f32 0.0036580483, %v293_v52 }
  0xb7   :  { %v932_v45 = vadd.f32 0.00028619796, %v931_v41  ;;  %v331_v46 = vmul.f32 2.1237322e-06, %v2180_v42  ;;  %v2185_v47 = vmul.f32 0.70710677, %v2173_v37  ;;  %v2188_v48 = vadd.f32 %v2079_v51, %v98_v43 }
  0xb8   :  { %v270_v11 = vmul.f32 %v269_v58, %v2104_v62  ;;  %v896_v20 = vadd.f32 0.05243302, %v895_v5  ;;  %v295_v21 = vmul.f32 %v294_v7, %v2143_v18 }
  0xb9   :  { %v969_v53 = vmul.f32 %v2185_v47, %v2185_v47  ;;  %v933_v54 = vmul.f32 %v932_v45, %v2167_v33  ;;  %v2195_v56 = vmul.f32 0.70710677, %v2188_v48  ;;  %v332_v59 = vadd.f32 0.00028619796, %v331_v46 }
  0xba   :  { %v2224_v27 = vadd.f32 1.0, %v270_v11  ;;  %v897_v38 = vmul.f32 %v896_v20, %v2127_v9  ;;  %v296_v39 = vadd.f32 0.05243302, %v295_v21  ;;  %v2243_v46 = vmul.f32 0.5, %v2088_v55 }
  0xbb   :  { %v2197_v61 = vmin.f32 %v969_v53, 16.0  ;;  %v369_v0 = vmul.f32 %v2195_v56, %v2195_v56  ;;  %v934_v10 = vadd.f32 0.0036580483, %v933_v54  ;;  %v333_v12 = vmul.f32 %v332_v59, %v2180_v42 }
  0xbc   :  { %v146_v60 = vpop.f32.mrf.mxu2  ;;  %1828 = vrcp.f32 %v2224_v27  ;;  %v258_v59 = vadd.f32 0.18741608, %v257_v36  ;;  %v297_v55 = vmul.f32 %v296_v39, %v2143_v18  ;;  %v2285_v36 = vmul.f32 3.8918573e-05, %v2127_v9 }
  0xbd   :  { %v2202_v1 = vadd.f32 %v2079_v51, %v146_v60  ;;  %v971_v14 = vmul.f32 2.1237322e-06, %v2197_v61  ;;  %v2212_v16 = vmin.f32 %v369_v0, 16.0  ;;  %v935_v25 = vmul.f32 %v934_v10, %v2167_v33 }
  0xbe   :  { %v101_v8 = vpop.f32.mrf.mxu0  ;;  %v334_v28 = vadd.f32 0.0036580483, %v333_v12  ;;  %v2256_v60 = vmul.f32 0.5, %v2116_v3  ;;  %v898_v0 = vadd.f32 0.18741608, %v897_v38  ;;  %v2268_v10 = vmul.f32 0.5, %v2152_v23 }
  0xbf   :  { %v2209_v13 = vmul.f32 0.70710677, %v2202_v1  ;;  %v2215_v17 = vadd.f32 %v2079_v51, %v101_v8  ;;  %v972_v31 = vadd.f32 0.00028619796, %v971_v14  ;;  %v371_v32 = vmul.f32 2.1237322e-06, %v2212_v16 }
  0xc0   :  { %v936_v43 = vadd.f32 0.05243302, %v935_v25  ;;  %v335_v50 = vmul.f32 %v334_v28, %v2180_v42  ;;  %v2265_v8 = vmul.f32 0.5, %v2137_v15  ;;  %v259_v15 = vmul.f32 %v258_v59, %v2104_v62 }
  0xc1   :  { %v1009_v24 = vmul.f32 %v2209_v13, %v2209_v13  ;;  %v2222_v26 = vmul.f32 0.70710677, %v2215_v17  ;;  %v973_v52 = vmul.f32 %v972_v31, %v2197_v61  ;;  %v372_v53 = vadd.f32 0.00028619796, %v371_v32 }
  0xc2   :  { %v937_v4 = vmul.f32 %v936_v43, %v2167_v33  ;;  %v336_v11 = vadd.f32 0.05243302, %v335_v50  ;;  %v2273_v14 = vpop.eup %1828  ;;  %v298_v25 = vadd.f32 0.18741608, %v297_v55  ;;  %v899_v31 = vmul.f32 %v898_v0, %v2127_v9 }
  0xc3   :  { %v409_v34 = vmul.f32 %v2222_v26, %v2222_v26  ;;  %v2234_v40 = vmin.f32 %v1009_v24, 16.0  ;;  %v974_v19 = vadd.f32 0.0036580483, %v973_v52  ;;  %v373_v20 = vmul.f32 %v372_v53, %v2212_v16 }
  0xc4   :  { %v149_v29 = vpop.f32.mrf.mxu2  ;;  %v938_v32 = vadd.f32 0.18741608, %v937_v4  ;;  %v337_v38 = vmul.f32 %v336_v11, %v2180_v42  ;;  %v2289_v39 = vmul.f32 0.5, %v2173_v37  ;;  %v299_v59 = vmul.f32 %v298_v25, %v2143_v18 }
  0xc5   :  { %v2230_v35 = vadd.f32 %v2079_v51, %v149_v29  ;;  %v2236_v44 = vmin.f32 %v409_v34, 16.0  ;;  %v1011_v63 = vmul.f32 2.1237322e-06, %v2234_v40  ;;  %v975_v43 = vmul.f32 %v974_v19, %v2197_v61 }
  0xc6   :  { %v104_v41 = vpop.f32.mrf.mxu0  ;;  %v374_v50 = vadd.f32 0.0036580483, %v373_v20  ;;  %v939_v0 = vmul.f32 %v938_v32, %v2167_v33  ;;  %v338_v11 = vadd.f32 0.18741608, %v337_v38  ;;  %vm278_vm0 = vweird.f32 %v2273_v14 }
  0xc7   :  { %v2239_v45 = vmul.f32 0.70710677, %v2230_v35  ;;  %v2253_v58 = vadd.f32 %v2079_v51, %v104_v41  ;;  %v411_v5 = vmul.f32 2.1237322e-06, %v2236_v44  ;;  %v1012_v23 = vadd.f32 0.00028619796, %v1011_v63 }
  0xc8   :  { %v273_v41 = vmul.f32 %v2273_v14, %v2224_v27  ;;  %v900_v63 = vadd.f32 1.1283791, %v899_v31  ;;  %vm277_vm1 = vweird.f32 %v2224_v27 }
  0xc9   :  { %v1049_v54 = vmul.f32 %v2239_v45, %v2239_v45  ;;  %v2271_v3 = vmul.f32 0.70710677, %v2253_v58  ;;  %v412_v34 = vadd.f32 0.00028619796, %v411_v5  ;;  %v1013_v55 = vmul.f32 %v1012_v23, %v2234_v40  ;;  %vm2364_vm2 = vmor %vm277_vm1, %vm278_vm0 }
  0xca   :  { %v274_v20 = vsub.f32 1.0, %v273_v41  ;;  %v2324_v41 = vmul.f32 %v900_v63, %v2113_v2  ;;  %v2337_v63 = vmul.f32 0.5, %v2215_v17 }
  0xcb   :  { %v2262_v7 = vmin.f32 %v1049_v54, 16.0  ;;  %v449_v28 = vmul.f32 %v2271_v3, %v2271_v3  ;;  %v260_v54 = vadd.f32 1.1283791, %v259_v15  ;;  %v413_v4 = vmul.f32 %v412_v34, %v2236_v44 }
  0xcc   :  { %v152_v12 = vpop.f32.mrf.mxu2  ;;  %v375_v15 = vmul.f32 %v374_v50, %v2212_v16  ;;  %v940_v34 = vadd.f32 1.1283791, %v939_v0  ;;  %3543 = vst [vmem:[#allocation4_spill] sm:$0xff] %v2337_v63 }
  0xcd   :  { %v1051_v21 = vmul.f32 2.1237322e-06, %v2262_v7  ;;  %v2278_v24 = vadd.f32 %v2079_v51, %v152_v12  ;;  %v2302_v37 = vmin.f32 %v449_v28, 16.0  ;;  %v2309_v12 = vmul.f32 0.5, %v2188_v48 }
  0xce   :  { %v107_v29 = vpop.f32.mrf.mxu0  ;;  %v300_v28 = vadd.f32 1.1283791, %v299_v59  ;;  %v261_v32 = vmul.f32 %v260_v54, %v2094_v57  ;;  %v2321_v48 = vmul.f32 0.5, %v2202_v1  ;;  %v414_v38 = vadd.f32 0.0036580483, %v413_v4 }
  0xcf   :  { %v2292_v62 = vadd.f32 %v2079_v51, %v107_v29  ;;  %v1052_v52 = vadd.f32 0.00028619796, %v1051_v21  ;;  %v2298_v53 = vmul.f32 0.70710677, %v2278_v24  ;;  %3541 = vst [vmem:[#allocation2_spill] sm:$0xff] %v2309_v12  ;;  %v275_v59 = vmul.f32 %v2273_v14, %v274_v20 }
  0xd0   :  { %v976_v21 = vadd.f32 0.05243302, %v975_v43  ;;  %v1014_v29 = vadd.f32 0.0036580483, %v1013_v55  ;;  %v451_v31 = vmul.f32 2.1237322e-06, %v2302_v37  ;;  %v339_v55 = vmul.f32 %v338_v11, %v2180_v42 }
  0xd1   :  { %v1089_v5 = vmul.f32 %v2298_v53, %v2298_v53  ;;  %v2312_v19 = vmul.f32 0.70710677, %v2292_v62  ;;  %v1053_v25 = vmul.f32 %v1052_v52, %v2262_v7  ;;  %3542 = vst [vmem:[#allocation3_spill] sm:$0xff] %v2321_v48  ;;  %v376_v54 = vadd.f32 0.05243302, %v375_v15 }
  0xd2   :  { %v977_v57 = vmul.f32 %v976_v21, %v2197_v61  ;;  %v2333_v1 = vmul.f32 %v300_v28, %v2122_v6  ;;  %v1015_v2 = vmul.f32 %v1014_v29, %v2234_v40  ;;  %v452_v4 = vadd.f32 0.00028619796, %v451_v31 }
  0xd3   :  { %v2316_v23 = vmin.f32 %v1089_v5, 16.0  ;;  %v489_v50 = vmul.f32 %v2312_v19, %v2312_v19  ;;  %v1054_v0 = vadd.f32 0.0036580483, %v1053_v25  ;;  %v2340_v5 = vmul.f32 %v940_v34, %v2149_v22 }
  0xd4   :  { %v155_v52 = vpop.f32.mrf.mxu2  ;;  %v415_v20 = vmul.f32 %v414_v38, %v2236_v44  ;;  %v2344_v11 = vmul.f32 0.5, %v2230_v35  ;;  %v276_v25 = vadd.f32 %v2273_v14, %v275_v59  ;;  %v340_v17 = vadd.f32 1.1283791, %v339_v55 }
  0xd5   :  { %v1091_v43 = vmul.f32 2.1237322e-06, %v2316_v23  ;;  %v2347_v21 = vadd.f32 %v2079_v51, %v155_v52  ;;  %v2349_v6 = vmin.f32 %v489_v50, 16.0  ;;  %v978_v28 = vadd.f32 0.18741608, %v977_v57 }
  0xd6   :  { %3544 = vst [vmem:[#allocation5_spill] sm:$0xff] %v2344_v11  ;;  %v377_v22 = vmul.f32 %v376_v54, %v2212_v16  ;;  %v1055_v29 = vmul.f32 %v1054_v0, %v2262_v7  ;;  %v1016_v31 = vadd.f32 0.05243302, %v1015_v2  ;;  %v453_v35 = vmul.f32 %v452_v4, %v2302_v37  ;;  %v110_v38 = vpop.f32.mrf.mxu0 }
  0xd7   :  { %v1092_v15 = vadd.f32 0.00028619796, %v1091_v43  ;;  %v281_v34 = vand.u32 2147483647, %v2224_v27  ;;  %v416_v43 = vadd.f32 0.05243302, %v415_v20  ;;  %v280_v0 = vsel %vm2364_vm2, %v2273_v14, %v276_v25 }
  0xd8   :  { %v2359_v50 = vmul.f32 0.5, %v2253_v58  ;;  %v2362_v52 = vmul.f32 0.70710677, %v2347_v21  ;;  %v283_v55 = vand.u32 2147483648, %v2224_v27  ;;  %v491_v54 = vmul.f32 2.1237322e-06, %v2349_v6 }
  0xd9   :  { %v1093_v57 = vmul.f32 %v1092_v15, %v2316_v23  ;;  %v903_v58 = vadd.f32 0.001143296, %v2285_v36  ;;  %v378_v2 = vadd.f32 0.18741608, %v377_v22  ;;  %v1056_v4 = vadd.f32 0.05243302, %v1055_v29 }
  0xda   :  { %3545 = vst [vmem:[#allocation6_spill] sm:$0xff] %v2359_v50  ;;  %v284_v20 = vor.u32 1.1754944e-38, %v283_v55  ;;  %v2376_v50 = vadd.f32 %v2079_v51, %v110_v38  ;;  %v979_v11 = vmul.f32 %v978_v28, %v2197_v61  ;;  %v1017_v27 = vmul.f32 %v1016_v31, %v2234_v40 }
  0xdb   :  { %v454_v63 = vadd.f32 0.0036580483, %v453_v35  ;;  %vm282_vm3 = vcmp.eq.f32.partialorder %v281_v34, 8.507059e+37  ;;  %v417_v15 = vmul.f32 %v416_v43, %v2236_v44  ;;  %v1129_v59 = vmul.f32 %v2362_v52, %v2362_v52 }
  0xdc   :  { %v285_v14 = vsel %vm282_vm3, %v284_v20, %v280_v0  ;;  %v904_v36 = vmul.f32 %v903_v58, %v2127_v9  ;;  %v2385_v25 = vmul.f32 %v340_v17, %v2162_v30  ;;  %v1094_v22 = vadd.f32 0.0036580483, %v1093_v57 }
  0xdd   :  { %v492_v29 = vadd.f32 0.00028619796, %v491_v54  ;;  %v286_v38 = vmul.f32 %v285_v14, %v261_v32  ;;  %v379_v28 = vmul.f32 %v378_v2, %v2212_v16  ;;  %v1057_v31 = vmul.f32 %v1056_v4, %v2262_v7 }
  0xde   :  { %v2390_v35 = vmul.f32 0.70710677, %v2376_v50  ;;  %v905_v34 = vadd.f32 0.014752088, %v904_v36  ;;  %v980_v43 = vadd.f32 1.1283791, %v979_v11  ;;  %v455_v0 = vmul.f32 %v454_v63, %v2302_v37 }
  0xdf   :  { %v1018_v55 = vadd.f32 0.18741608, %v1017_v27  ;;  %v1762_v20 = vclamps-f32 %v286_v38, 1.0  ;;  %v418_v58 = vadd.f32 0.18741608, %v417_v15  ;;  %v2393_v48 = vmin.f32 %v1129_v59, 16.0 }
  0xe0   :  { %v906_v30 = vmul.f32 %v905_v34, %v2127_v9  ;;  %v302_v32 = vmul.f32 3.8918573e-05, %v2143_v18  ;;  %v2398_v17 = vmul.f32 0.5, %v2278_v24  ;;  %v1095_v57 = vmul.f32 %v1094_v22, %v2316_v23  ;;  %v158_v34 = vpop.f32.mrf.mxu2 }
  0xe1   :  { %v493_v54 = vmul.f32 %v492_v29, %v2349_v6  ;;  %v1529_v2 = vadd.f32 1.0, %v1762_v20  ;;  %v380_v11 = vadd.f32 1.1283791, %v379_v28  ;;  %v1058_v4 = vadd.f32 0.18741608, %v1057_v31 }
  0xe2   :  { %3548 = vst [vmem:[#allocation7_spill] sm:$0xff] %v2398_v17  ;;  %v529_v63 = vmul.f32 %v2390_v35, %v2390_v35  ;;  %v907_v27 = vadd.f32 0.112945676, %v906_v30  ;;  %v1019_v15 = vmul.f32 %v1018_v55, %v2234_v40  ;;  %v456_v59 = vadd.f32 0.05243302, %v455_v0 }
  0xe3   :  { %v1561_v14 = vmul.f32 %v1529_v2, %v2243_v46  ;;  %v303_v36 = vadd.f32 0.001143296, %v302_v32  ;;  %v419_v24 = vmul.f32 %v418_v58, %v2236_v44  ;;  %v1131_v38 = vmul.f32 2.1237322e-06, %v2393_v48 }
  0xe4   :  { %v908_v22 = vmul.f32 %v907_v27, %v2127_v9  ;;  %v942_v29 = vmul.f32 3.8918573e-05, %v2167_v33  ;;  %v1096_v28 = vadd.f32 0.05243302, %v1095_v57  ;;  %v494_v31 = vadd.f32 0.0036580483, %v493_v54 }
  0xe5   :  { %1629 = vmatmul.f32.vlgmr.msra.gmra.mxu1 %v1561_v14  ;;  %v304_v20 = vmul.f32 %v303_v36, %v2143_v18  ;;  %v342_v55 = vmul.f32 3.8918573e-05, %v2180_v42  ;;  %v1059_v0 = vmul.f32 %v1058_v4, %v2262_v7  ;;  %v2413_v46 = vmin.f32 %v529_v63, 16.0 }
  0xe6   :  { %v909_v30 = vadd.f32 0.4994258, %v908_v22  ;;  %v943_v58 = vadd.f32 0.001143296, %v942_v29  ;;  %v1020_v32 = vadd.f32 1.1283791, %v1019_v15  ;;  %v457_v2 = vmul.f32 %v456_v59, %v2302_v37 }
  0xe7   :  { %v305_v27 = vadd.f32 0.014752088, %v304_v20  ;;  %v343_v17 = vadd.f32 0.001143296, %v342_v55  ;;  %v420_v12 = vadd.f32 1.1283791, %v419_v24  ;;  %v2418_v14 = vadd.f32 %v2079_v51, %v158_v34 }
  0xe8   :  { %v1132_v57 = vadd.f32 0.00028619796, %v1131_v38  ;;  %v910_v54 = vmul.f32 %v909_v30, %v2127_v9  ;;  %v1097_v36 = vmul.f32 %v1096_v28, %v2316_v23  ;;  %v495_v4 = vmul.f32 %v494_v31, %v2349_v6 }
  0xe9   :  { %v306_v63 = vmul.f32 %v305_v27, %v2143_v18  ;;  %v944_v22 = vmul.f32 %v943_v58, %v2167_v33  ;;  %v2425_v15 = vmul.f32 %v980_v43, %v2185_v47  ;;  %v1060_v59 = vadd.f32 1.1283791, %v1059_v0 }
  0xea   :  { %v531_v24 = vmul.f32 2.1237322e-06, %v2413_v46  ;;  %v2428_v38 = vadd.f32 1.0, %v910_v54  ;;  %v458_v9 = vadd.f32 0.18741608, %v457_v2  ;;  %v344_v20 = vmul.f32 %v343_v17, %v2180_v42 }
  0xeb   :  { %v307_v29 = vadd.f32 0.112945676, %v306_v63  ;;  %v945_v34 = vadd.f32 0.014752088, %v944_v22  ;;  %v2432_v28 = vmul.f32 %v380_v11, %v2195_v56  ;;  %v2435_v31 = vmul.f32 0.5, %v2292_v62 }
  0xec   :  { %1830 = vrcp.f32 %v2428_v38  ;;  %v2439_v47 = vmul.f32 0.70710677, %v2418_v14  ;;  %v1098_v43 = vadd.f32 0.18741608, %v1097_v36  ;;  %v496_v55 = vadd.f32 0.05243302, %v495_v4 }
  0xed   :  { %3549 = vst [vmem:[#allocation8_spill] sm:$0xff] %v2435_v31  ;;  %v1133_v0 = vmul.f32 %v1132_v57, %v2393_v48  ;;  %v308_v30 = vmul.f32 %v307_v29, %v2143_v18  ;;  %v2444_v58 = vmul.f32 %v1020_v32, %v2209_v13  ;;  %v2447_v56 = vmul.f32 0.5, %v2347_v21  ;;  %v113_v57 = vpop.f32.mrf.mxu0 }
  0xee   :  { %v532_v17 = vadd.f32 0.00028619796, %v531_v24  ;;  %v946_v62 = vmul.f32 %v945_v34, %v2167_v33  ;;  %v2451_v11 = vmul.f32 %v420_v12, %v2222_v26  ;;  %v2454_v2 = vmul.f32 %v1060_v59, %v2239_v45 }
  0xef   :  { %3550 = vst [vmem:[#allocation9_spill] sm:$0xff] %v2447_v56  ;;  %v459_v27 = vmul.f32 %v458_v9, %v2302_v37  ;;  %v345_v54 = vadd.f32 0.014752088, %v344_v20  ;;  %v1169_v13 = vmul.f32 %v2439_v47, %v2439_v47  ;;  %v309_v32 = vadd.f32 0.4994258, %v308_v30 }
  0xf0   :  { %v2460_v21 = vadd.f32 %v2079_v51, %v113_v57  ;;  %v947_v36 = vadd.f32 0.112945676, %v946_v62  ;;  %v1099_v4 = vmul.f32 %v1098_v43, %v2316_v23  ;;  %v497_v26 = vmul.f32 %v496_v55, %v2349_v6 }
  0xf1   :  { %v1134_v12 = vadd.f32 0.0036580483, %v1133_v0  ;;  %v2465_v45 = vmul.f32 0.5, %v2376_v50  ;;  %v533_v22 = vmul.f32 %v532_v17, %v2413_v46  ;;  %v310_v59 = vmul.f32 %v309_v32, %v2143_v18 }
  0xf2   :  { %v1831_v63 = vpop.eup %1830  ;;  %v2470_v24 = vmul.f32 0.70710677, %v2460_v21  ;;  %v948_v9 = vmul.f32 %v947_v36, %v2167_v33  ;;  %v460_v29 = vadd.f32 1.1283791, %v459_v27  ;;  %v346_v20 = vmul.f32 %v345_v54, %v2180_v42 }
  0xf3   :  { %3551 = vst [vmem:[#allocation10_spill] sm:$0xff] %v2465_v45  ;;  %v913_v34 = vmul.f32 %v1831_v63, %v2428_v38  ;;  %v982_v43 = vmul.f32 3.8918573e-05, %v2197_v61  ;;  %v2476_v55 = vmin.f32 %v1169_v13, 16.0  ;;  %v2478_v50 = vadd.f32 1.0, %v310_v59  ;;  %v161_v59 = vpop.f32.mrf.mxu2 }
  0xf4   :  { %v569_v0 = vmul.f32 %v2470_v24, %v2470_v24  ;;  %v949_v18 = vadd.f32 0.4994258, %v948_v9  ;;  %v1100_v30 = vadd.f32 1.1283791, %v1099_v4  ;;  %v498_v17 = vadd.f32 0.18741608, %v497_v26 }
  0xf5   :  { %v1135_v62 = vmul.f32 %v1134_v12, %v2393_v48  ;;  %v914_v57 = vsub.f32 1.0, %v913_v34  ;;  %v534_v27 = vadd.f32 0.0036580483, %v533_v22  ;;  %v921_v32 = vand.u32 2147483647, %v2428_v38 }
  0xf6   :  { %v923_v54 = vand.u32 2147483648, %v2428_v38  ;;  %1832 = vrcp.f32 %v2478_v50  ;;  %vm918_vm4 = vweird.f32 %v1831_v63  ;;  %v950_v36 = vmul.f32 %v949_v18, %v2167_v33 }
  0xf7   :  { %v915_v13 = vmul.f32 %v1831_v63, %v914_v57  ;;  %v347_v45 = vadd.f32 0.112945676, %v346_v20  ;;  %v2488_v9 = vmul.f32 %v460_v29, %v2271_v3  ;;  %v1171_v4 = vmul.f32 2.1237322e-06, %v2476_v55 }
  0xf8   :  { %v2491_v26 = vmin.f32 %v569_v0, 16.0  ;;  %v983_v12 = vadd.f32 0.001143296, %v982_v43  ;;  %v499_v22 = vmul.f32 %v498_v17, %v2349_v6  ;;  %vm917_vm5 = vweird.f32 %v2428_v38 }
  0xf9   :  { %v916_v34 = vadd.f32 %v1831_v63, %v915_v13  ;;  %v2495_v56 = vadd.f32 1.0, %v950_v36  ;;  %v1136_v57 = vadd.f32 0.05243302, %v1135_v62  ;;  %v535_v33 = vmul.f32 %v534_v27, %v2413_v46  ;;  %vm919_vm6 = vmor %vm917_vm5, %vm918_vm4 }
  0xfa   :  { %v924_v20 = vor.u32 1.1754944e-38, %v923_v54  ;;  %v2499_v3 = vadd.f32 %v2079_v51, %v161_v59  ;;  %vm922_vm7 = vcmp.eq.f32.partialorder %v921_v32, 8.507059e+37  ;;  %v348_v43 = vmul.f32 %v347_v45, %v2180_v42 }
  0xfb   :  { %v920_v29 = vsel %vm919_vm6, %v1831_v63, %v916_v34  ;;  %1834 = vrcp.f32 %v2495_v56  ;;  %v1172_v17 = vadd.f32 0.00028619796, %v1171_v4  ;;  %v571_v38 = vmul.f32 2.1237322e-06, %v2491_v26 }
  0xfc   :  { %v1833_v0 = vpop.eup %1832  ;;  %v925_v18 = vsel %vm922_vm7, %v924_v20, %v920_v29  ;;  %v984_v62 = vmul.f32 %v983_v12, %v2197_v61  ;;  %v2506_v27 = vmul.f32 %v1100_v30, %v2298_v53  ;;  %v500_v54 = vadd.f32 1.1283791, %v499_v22 }
  0xfd   :  { %v926_v13 = vmul.f32 %v925_v18, %v2324_v41  ;;  %v313_v63 = vmul.f32 %v1833_v0, %v2478_v50  ;;  %v1137_v32 = vmul.f32 %v1136_v57, %v2393_v48  ;;  %v536_v36 = vadd.f32 0.05243302, %v535_v33 }
  0xfe   :  { %3552 = vst [vmem:[#allocation11_spill] sm:$0xff] %v2506_v27  ;;  %v321_v45 = vand.u32 2147483647, %v2478_v50  ;;  %v2513_v59 = vmul.f32 0.70710677, %v2499_v3  ;;  %v323_v12 = vand.u32 2147483648, %v2478_v50  ;;  %v1173_v53 = vmul.f32 %v1172_v17, %v2476_v55 }
  0xff   :  { %v1778_v4 = vclamps-f32 %v926_v13, 1.0  ;;  %v314_v34 = vsub.f32 1.0, %v313_v63  ;;  %v349_v20 = vadd.f32 0.4994258, %v348_v43  ;;  %v572_v30 = vadd.f32 0.00028619796, %v571_v38 }
 0x100   :  { %v985_v22 = vadd.f32 0.014752088, %v984_v62  ;;  %v382_v41 = vmul.f32 3.8918573e-05, %v2212_v16  ;;  %vm318_vm8 = vweird.f32 %v1833_v0  ;;  %vm317_vm9 = vweird.f32 %v2478_v50 }
 0x101   :  { %v1835_v29 = vpop.eup %1834  ;;  %v1545_v18 = vadd.f32 1.0, %v1778_v4  ;;  %v315_v57 = vmul.f32 %v1833_v0, %v314_v34  ;;  %v350_v33 = vmul.f32 %v349_v20, %v2180_v42  ;;  %vm2520_vm10 = vcmp.eq.f32.partialorder %v321_v45, 8.507059e+37  ;;  %vm319_vm11 = vmor %vm317_vm9, %vm318_vm8 }
 0x102   :  { %v953_v43 = vmul.f32 %v1835_v29, %v2495_v56  ;;  %v1209_v17 = vmul.f32 %v2513_v59, %v2513_v59  ;;  %v324_v63 = vor.u32 1.1754944e-38, %v323_v12  ;;  %v961_v42 = vand.u32 2147483647, %v2495_v56 }
 0x103   :  { %v1577_v38 = vmul.f32 %v1545_v18, %v2246_v49  ;;  %v316_v62 = vadd.f32 %v1833_v0, %v315_v57  ;;  %v2528_v4 = vadd.f32 1.0, %v350_v33  ;;  %v986_v50 = vmul.f32 %v985_v22, %v2197_v61  ;;  %v116_v57 = vpop.f32.mrf.mxu0 }
 0x104   :  { %v954_v34 = vsub.f32 1.0, %v953_v43  ;;  %v383_v45 = vadd.f32 0.001143296, %v382_v41  ;;  %v573_v31 = vmul.f32 %v572_v30, %v2491_v26  ;;  %v963_v27 = vand.u32 2147483648, %v2495_v56 }
 0x105   :  { %1677 = vmatmul.f32.vlgmr.msra.gmra.mxu3 %v1577_v38  ;;  %v320_v20 = vsel %vm319_vm11, %v1833_v0, %v316_v62  ;;  %1836 = vrcp.f32 %v2528_v4  ;;  %vm958_vm12 = vweird.f32 %v1835_v29  ;;  %v2537_v18 = vmin.f32 %v1209_v17, 16.0 }
 0x106   :  { %v325_v49 = vsel %vm2520_vm10, %v324_v63, %v320_v20  ;;  %v955_v12 = vmul.f32 %v1835_v29, %v954_v34  ;;  %v1138_v33 = vadd.f32 0.18741608, %v1137_v32  ;;  %v537_v22 = vmul.f32 %v536_v36, %v2413_v46 }
 0x107   :  { %v1174_v41 = vadd.f32 0.0036580483, %v1173_v53  ;;  %v326_v0 = vmul.f32 %v325_v49, %v2333_v1  ;;  %vm957_vm13 = vweird.f32 %v2495_v56  ;;  %vm962_vm14 = vcmp.eq.f32.partialorder %v961_v42, 8.507059e+37 }
 0x108   :  { %v956_v43 = vadd.f32 %v1835_v29, %v955_v12  ;;  %v987_v30 = vadd.f32 0.112945676, %v986_v50  ;;  %vm959_vm15 = vmor %vm957_vm13, %vm958_vm12  ;;  %v964_v13 = vor.u32 1.1754944e-38, %v963_v27  ;;  %v2543_v62 = vadd.f32 %v2079_v51, %v116_v57 }
 0x109   :  { %v1763_v38 = vclamps-f32 %v326_v0, 1.0  ;;  %v384_v17 = vmul.f32 %v383_v45, %v2212_v16  ;;  %v574_v63 = vadd.f32 0.0036580483, %v573_v31  ;;  %v1211_v36 = vmul.f32 2.1237322e-06, %v2537_v18  ;;  %v164_v31 = vpop.f32.mrf.mxu2 }
 0x10a   :  { %v960_v32 = vsel %vm959_vm15, %v1835_v29, %v956_v43  ;;  %v988_v53 = vmul.f32 %v987_v30, %v2197_v61  ;;  %v2549_v34 = vmul.f32 %v500_v54, %v2312_v19  ;;  %v1139_v27 = vmul.f32 %v1138_v33, %v2393_v48 }
 0x10b   :  { %v1837_v1 = vpop.eup %1836  ;;  %v1530_v56 = vadd.f32 1.0, %v1763_v38  ;;  %v965_v42 = vsel %vm962_vm14, %v964_v13, %v960_v32  ;;  %v385_v50 = vadd.f32 0.014752088, %v384_v17  ;;  %v538_v20 = vadd.f32 0.18741608, %v537_v22 }
 0x10c   :  { %v966_v49 = vmul.f32 %v965_v42, %v2340_v5  ;;  %v353_v45 = vmul.f32 %v1837_v1, %v2528_v4  ;;  %v1175_v29 = vmul.f32 %v1174_v41, %v2476_v55  ;;  %v2557_v57 = vmul.f32 0.70710677, %v2543_v62 }
 0x10d   :  { %v1562_v12 = vmul.f32 %v1530_v56, %v2256_v60  ;;  %v989_v19 = vadd.f32 0.4994258, %v988_v53  ;;  %v575_v54 = vmul.f32 %v574_v63, %v2491_v26  ;;  %v1212_v43 = vadd.f32 0.00028619796, %v1211_v36 }
 0x10e   :  { %v1779_v0 = vclamps-f32 %v966_v49, 1.0  ;;  %v354_v30 = vsub.f32 1.0, %v353_v45  ;;  %v363_v33 = vand.u32 2147483648, %v2528_v4  ;;  %v2563_v22 = vadd.f32 %v2079_v51, %v164_v31 }
 0x10f   :  { %1632 = vmatmul.f32.gmra.mxu1 %v1562_v12  ;;  %v990_v5 = vmul.f32 %v989_v19, %v2197_v61  ;;  %v386_v41 = vmul.f32 %v385_v50, %v2212_v16  ;;  %vm358_vm0 = vweird.f32 %v1837_v1  ;;  %v361_v13 = vand.u32 2147483647, %v2528_v4 }
 0x110   :  { %v1546_v60 = vadd.f32 1.0, %v1779_v0  ;;  %v355_v38 = vmul.f32 %v1837_v1, %v354_v30  ;;  %vm357_vm1 = vweird.f32 %v2528_v4  ;;  %v609_v17 = vmul.f32 %v2557_v57, %v2557_v57 }
 0x111   :  { %v2570_v63 = vadd.f32 1.0, %v990_v5  ;;  %v2573_v32 = vmul.f32 0.70710677, %v2563_v22  ;;  %v387_v53 = vadd.f32 0.112945676, %v386_v41  ;;  %v2578_v50 = vmul.f32 0.5, %v2418_v14  ;;  %vm359_vm2 = vmor %vm357_vm1, %vm358_vm0 }
 0x112   :  { %v1578_v61 = vmul.f32 %v1546_v60, %v2265_v8  ;;  %v356_v36 = vadd.f32 %v1837_v1, %v355_v38  ;;  %v1022_v56 = vmul.f32 3.8918573e-05, %v2234_v40  ;;  %v1140_v42 = vadd.f32 1.1283791, %v1139_v27 }
 0x113   :  { %v364_v4 = vor.u32 1.1754944e-38, %v363_v33  ;;  %1838 = vrcp.f32 %v2570_v63  ;;  %v539_v49 = vmul.f32 %v538_v20, %v2413_v46  ;;  %vm362_vm3 = vcmp.eq.f32.partialorder %v361_v13, 8.507059e+37  ;;  %v119_v33 = vpop.f32.mrf.mxu0 }
 0x114   :  { %1680 = vmatmul.f32.gmra.mxu3 %v1578_v61  ;;  %v360_v45 = vsel %vm359_vm2, %v1837_v1, %v356_v36  ;;  %v1249_v8 = vmul.f32 %v2573_v32, %v2573_v32  ;;  %v1176_v31 = vadd.f32 0.05243302, %v1175_v29  ;;  %v576_v12 = vadd.f32 0.05243302, %v575_v54 }
 0x115   :  { %v365_v19 = vsel %vm362_vm3, %v364_v4, %v360_v45  ;;  %v388_v27 = vmul.f32 %v387_v53, %v2212_v16  ;;  %v1213_v14 = vmul.f32 %v1212_v43, %v2537_v18  ;;  %v2587_v30 = vmin.f32 %v609_v17, 16.0 }
 0x116   :  { %v366_v0 = vmul.f32 %v365_v19, %v2385_v25  ;;  %v1023_v5 = vadd.f32 0.001143296, %v1022_v56  ;;  %v2590_v20 = vmul.f32 %v1140_v42, %v2362_v52  ;;  %v2593_v1 = vmul.f32 0.5, %v2460_v21 }
 0x117   :  { %v389_v41 = vadd.f32 0.4994258, %v388_v27  ;;  %v2596_v29 = vadd.f32 %v2079_v51, %v119_v33  ;;  %v2598_v60 = vmin.f32 %v1249_v8, 16.0  ;;  %v422_v25 = vmul.f32 3.8918573e-05, %v2236_v44 }
 0x118   :  { %3555 = vst [vmem:[#allocation12_spill] sm:$0xff] %v2593_v1  ;;  %v1764_v54 = vclamps-f32 %v366_v0, 1.0  ;;  %v1024_v43 = vmul.f32 %v1023_v5, %v2234_v40  ;;  %v2602_v13 = vadd.f32 1.1283791, %v539_v49  ;;  %v1177_v52 = vmul.f32 %v1176_v31, %v2476_v55 }
 0x119   :  { %v1839_v38 = vpop.eup %1838  ;;  %v577_v17 = vmul.f32 %v576_v12, %v2491_v26  ;;  %v390_v21 = vmul.f32 %v389_v41, %v2212_v16  ;;  %v1214_v61 = vadd.f32 0.0036580483, %v1213_v14  ;;  %v611_v51 = vmul.f32 2.1237322e-06, %v2587_v30 }
 0x11a   :  { %v1531_v36 = vadd.f32 1.0, %v1764_v54  ;;  %v993_v53 = vmul.f32 %v1839_v38, %v2570_v63  ;;  %v1003_v56 = vand.u32 2147483648, %v2570_v63  ;;  %v2613_v4 = vmul.f32 0.70710677, %v2596_v29 }
 0x11b   :  { %v2610_v42 = vadd.f32 1.0, %v390_v21  ;;  %v1025_v49 = vadd.f32 0.014752088, %v1024_v43  ;;  %v1251_v31 = vmul.f32 2.1237322e-06, %v2598_v60  ;;  %v1215_v14 = vmul.f32 %v1214_v61, %v2537_v18 }
 0x11c   :  { %v1563_v45 = vmul.f32 %v1531_v36, %v2268_v10  ;;  %v994_v8 = vsub.f32 1.0, %v993_v53  ;;  %v423_v16 = vadd.f32 0.001143296, %v422_v25  ;;  %v1178_v12 = vadd.f32 0.18741608, %v1177_v52 }
 0x11d   :  { %v578_v19 = vadd.f32 0.18741608, %v577_v17  ;;  %1840 = vrcp.f32 %v2610_v42  ;;  %v1062_v27 = vmul.f32 3.8918573e-05, %v2262_v7  ;;  %vm998_vm4 = vweird.f32 %v1839_v38 }
 0x11e   :  { %1635 = vmatmul.f32.gmra.mxu1 %v1563_v45  ;;  %v995_v0 = vmul.f32 %v1839_v38, %v994_v8  ;;  %v1001_v33 = vand.u32 2147483647, %v2570_v63  ;;  %v612_v5 = vadd.f32 0.00028619796, %v611_v51  ;;  %v649_v10 = vmul.f32 %v2613_v4, %v2613_v4 }
 0x11f   :  { %v1026_v41 = vmul.f32 %v1025_v49, %v2234_v40  ;;  %v424_v54 = vmul.f32 %v423_v16, %v2236_v44  ;;  %vm997_vm5 = vweird.f32 %v2570_v63  ;;  %v1004_v25 = vor.u32 1.1754944e-38, %v1003_v56 }
 0x120   :  { %v996_v43 = vadd.f32 %v1839_v38, %v995_v0  ;;  %v1252_v52 = vadd.f32 0.00028619796, %v1251_v31  ;;  %v1179_v17 = vmul.f32 %v1178_v12, %v2476_v55  ;;  %vm999_vm6 = vmor %vm997_vm5, %vm998_vm4  ;;  %v1063_v36 = vadd.f32 0.001143296, %v1062_v27  ;;  %v167_v27 = vpop.f32.mrf.mxu2  ;;  %v2640_v0 = vld [vmem:[%s3527_s2] ss:$0 sm:$0xff] }
 0x121   :  { %v1027_v21 = vadd.f32 0.112945676, %v1026_v41  ;;  %v425_v61 = vadd.f32 0.014752088, %v424_v54  ;;  %v579_v51 = vmul.f32 %v578_v19, %v2491_v26  ;;  %v1216_v53 = vadd.f32 0.05243302, %v1215_v14 }
 0x122   :  { %v1000_v45 = vsel %vm999_vm6, %v1839_v38, %v996_v43  ;;  %vm1002_vm7 = vcmp.eq.f32.partialorder %v1001_v33, 8.507059e+37  ;;  %v2628_v1 = vmin.f32 %v649_v10, 16.0  ;;  %v613_v56 = vmul.f32 %v612_v5, %v2587_v30 }
 0x123   :  { %v1841_v8 = vpop.eup %1840  ;;  %v1005_v49 = vsel %vm1002_vm7, %v1004_v25, %v1000_v45  ;;  %v1028_v16 = vmul.f32 %v1027_v21, %v2234_v40  ;;  %v426_v63 = vmul.f32 %v425_v61, %v2236_v44  ;;  %v1064_v19 = vmul.f32 %v1063_v36, %v2262_v7 }
 0x124   :  { %v1006_v31 = vmul.f32 %v1005_v49, %v2425_v15  ;;  %v393_v12 = vmul.f32 %v1841_v8, %v2610_v42  ;;  %v1253_v38 = vmul.f32 %v1252_v52, %v2598_v60  ;;  %v2643_v33 = vadd.f32 %v2640_v0, %v167_v27 }
 0x125   :  { %v1029_v14 = vadd.f32 0.4994258, %v1028_v16  ;;  %v427_v10 = vadd.f32 0.112945676, %v426_v63  ;;  %v401_v15 = vand.u32 2147483647, %v2610_v42  ;;  %vm398_vm8 = vweird.f32 %v1841_v8 }
 0x126   :  { %v1780_v5 = vclamps-f32 %v1006_v31, 1.0  ;;  %v394_v41 = vsub.f32 1.0, %v393_v12  ;;  %v403_v54 = vand.u32 2147483648, %v2610_v42  ;;  %v651_v43 = vmul.f32 2.1237322e-06, %v2628_v1 }
 0x127   :  { %v1030_v25 = vmul.f32 %v1029_v14, %v2234_v40  ;;  %v2650_v52 = vmul.f32 0.70710677, %v2643_v33  ;;  %v428_v36 = vmul.f32 %v427_v10, %v2236_v44  ;;  %v1065_v45 = vadd.f32 0.014752088, %v1064_v19 }
 0x128   :  { %v1547_v21 = vadd.f32 1.0, %v1780_v5  ;;  %v395_v61 = vmul.f32 %v1841_v8, %v394_v41  ;;  %v1217_v49 = vmul.f32 %v1216_v53, %v2537_v18  ;;  %v614_v16 = vadd.f32 0.0036580483, %v613_v56  ;;  %v122_v53 = vpop.f32.mrf.mxu0 }
 0x129   :  { %v2654_v63 = vadd.f32 1.0, %v1030_v25  ;;  %v1289_v31 = vmul.f32 %v2650_v52, %v2650_v52  ;;  %vm397_vm9 = vweird.f32 %v2610_v42  ;;  %v429_v40 = vadd.f32 0.4994258, %v428_v36 }
 0x12a   :  { %v1579_v12 = vmul.f32 %v1547_v21, %v2289_v39  ;;  %v396_v27 = vadd.f32 %v1841_v8, %v395_v61  ;;  %v1254_v14 = vadd.f32 0.0036580483, %v1253_v38  ;;  %vm399_vm10 = vmor %vm397_vm9, %vm398_vm8  ;;  %vm402_vm11 = vcmp.eq.f32.partialorder %v401_v15, 8.507059e+37 }
 0x12b   :  { %v404_v10 = vor.u32 1.1754944e-38, %v403_v54  ;;  %1842 = vrcp.f32 %v2654_v63  ;;  %v652_v19 = vadd.f32 0.00028619796, %v651_v43  ;;  %v2662_v5 = vmin.f32 %v1289_v31, 16.0 }
 0x12c   :  { %1683 = vmatmul.f32.gmra.mxu3 %v1579_v12  ;;  %v400_v56 = vsel %vm399_vm10, %v1841_v8, %v396_v27  ;;  %v1066_v41 = vmul.f32 %v1065_v45, %v2262_v7  ;;  %v2667_v39 = vmul.f32 %v2602_v13, %v2390_v35  ;;  %v1180_v42 = vadd.f32 1.1283791, %v1179_v17 }
 0x12d   :  { %v405_v38 = vsel %vm402_vm11, %v404_v10, %v400_v56  ;;  %v430_v25 = vmul.f32 %v429_v40, %v2236_v44  ;;  %v580_v15 = vadd.f32 1.1283791, %v579_v51  ;;  %v1218_v54 = vadd.f32 0.18741608, %v1217_v49 }
 0x12e   :  { %v406_v21 = vmul.f32 %v405_v38, %v2432_v28  ;;  %v2672_v61 = vadd.f32 %v2640_v0, %v122_v53  ;;  %v615_v8 = vmul.f32 %v614_v16, %v2587_v30  ;;  %v1255_v43 = vmul.f32 %v1254_v14, %v2598_v60  ;;  %v3556_v53 = vld [vmem:[#allocation2_spill] sm:$0xff] }
 0x12f   :  { %v1291_v36 = vmul.f32 2.1237322e-06, %v2662_v5  ;;  %v2677_v45 = vadd.f32 1.0, %v430_v25  ;;  %v2680_v35 = vmul.f32 0.5, %v2499_v3  ;;  %v653_v44 = vmul.f32 %v652_v19, %v2628_v1 }
 0x130   :  { %v1765_v13 = vclamps-f32 %v406_v21, 1.0  ;;  %v1067_v17 = vadd.f32 0.112945676, %v1066_v41  ;;  %v2684_v28 = vmul.f32 %v1180_v42, %v2439_v47  ;;  %v2688_v49 = vmul.f32 0.70710677, %v2672_v61 }
 0x131   :  { %v1843_v51 = vpop.eup %1842  ;;  %1844 = vrcp.f32 %v2677_v45  ;;  %v462_v16 = vmul.f32 3.8918573e-05, %v2302_v37  ;;  %v1219_v31 = vmul.f32 %v1218_v54, %v2537_v18  ;;  %v2693_v3 = vmul.f32 0.5, %v2543_v62 }
 0x132   :  { %v1532_v12 = vadd.f32 1.0, %v1765_v13  ;;  %v1033_v27 = vmul.f32 %v1843_v51, %v2654_v63  ;;  %v2697_v40 = vmul.f32 %v580_v15, %v2470_v24  ;;  %v616_v47 = vadd.f32 0.05243302, %v615_v8 }
 0x133   :  { %v1256_v14 = vadd.f32 0.05243302, %v1255_v43  ;;  %v1292_v10 = vadd.f32 0.00028619796, %v1291_v36  ;;  %v654_v19 = vadd.f32 0.0036580483, %v653_v44  ;;  %v1068_v42 = vmul.f32 %v1067_v17, %v2262_v7 }
 0x134   :  { %v1564_v56 = vmul.f32 %v1532_v12, %v3556_v53  ;;  %v1034_v41 = vsub.f32 1.0, %v1033_v27  ;;  %v1041_v38 = vand.u32 2147483647, %v2654_v63  ;;  %v1043_v62 = vand.u32 2147483648, %v2654_v63 }
 0x135   :  { %v689_v25 = vmul.f32 %v2688_v49, %v2688_v49  ;;  %v463_v54 = vadd.f32 0.001143296, %v462_v16  ;;  %v1220_v21 = vadd.f32 1.1283791, %v1219_v31  ;;  %vm1038_vm12 = vweird.f32 %v1843_v51 }
 0x136   :  { %1638 = vmatmul.f32.gmra.mxu1 %v1564_v56  ;;  %v1035_v24 = vmul.f32 %v1843_v51, %v1034_v41  ;;  %v1069_v15 = vadd.f32 0.4994258, %v1068_v42  ;;  %v617_v43 = vmul.f32 %v616_v47, %v2587_v30  ;;  %v1257_v36 = vmul.f32 %v1256_v14, %v2598_v60 }
 0x137   :  { %v1845_v8 = vpop.eup %1844  ;;  %v1293_v13 = vmul.f32 %v1292_v10, %v2662_v5  ;;  %v464_v44 = vmul.f32 %v463_v54, %v2302_v37  ;;  %v655_v17 = vmul.f32 %v654_v19, %v2628_v1  ;;  %vm1037_vm13 = vweird.f32 %v2654_v63 }
 0x138   :  { %v1036_v12 = vadd.f32 %v1843_v51, %v1035_v24  ;;  %v433_v16 = vmul.f32 %v1845_v8, %v2677_v45  ;;  %vm1039_vm14 = vmor %vm1037_vm13, %vm1038_vm12  ;;  %vm1042_vm15 = vcmp.eq.f32.partialorder %v1041_v38, 8.507059e+37  ;;  %v1044_v31 = vor.u32 1.1754944e-38, %v1043_v62 }
 0x139   :  { %v2712_v27 = vmin.f32 %v689_v25, 16.0  ;;  %v1070_v47 = vmul.f32 %v1069_v15, %v2262_v7  ;;  %v441_v10 = vand.u32 2147483647, %v2677_v45  ;;  %v465_v56 = vadd.f32 0.014752088, %v464_v44 }
 0x13a   :  { %v1040_v53 = vsel %vm1039_vm14, %v1843_v51, %v1036_v12  ;;  %v434_v14 = vsub.f32 1.0, %v433_v16  ;;  %v1294_v42 = vadd.f32 0.0036580483, %v1293_v13  ;;  %v443_v19 = vand.u32 2147483648, %v2677_v45  ;;  %v170_v13 = vpop.f32.mrf.mxu2 }
 0x13b   :  { %v1045_v41 = vsel %vm1042_vm15, %v1044_v31, %v1040_v53  ;;  %v2717_v54 = vadd.f32 1.0, %v1070_v47  ;;  %vm438_vm0 = vweird.f32 %v1845_v8  ;;  %v466_v38 = vmul.f32 %v465_v56, %v2302_v37 }
 0x13c   :  { %v1046_v63 = vmul.f32 %v1045_v41, %v2444_v58  ;;  %v435_v24 = vmul.f32 %v1845_v8, %v434_v14  ;;  %v618_v62 = vadd.f32 0.18741608, %v617_v43  ;;  %v1258_v25 = vadd.f32 0.18741608, %v1257_v36 }
 0x13d   :  { %v691_v7 = vmul.f32 2.1237322e-06, %v2712_v27  ;;  %1846 = vrcp.f32 %v2717_v54  ;;  %vm437_vm1 = vweird.f32 %v2677_v45  ;;  %v1102_v44 = vmul.f32 3.8918573e-05, %v2316_v23 }
 0x13e   :  { %v1781_v51 = vclamps-f32 %v1046_v63, 1.0  ;;  %v436_v15 = vadd.f32 %v1845_v8, %v435_v24  ;;  %v2726_v12 = vmul.f32 0.5, %v2563_v22  ;;  %v656_v58 = vadd.f32 0.05243302, %v655_v17  ;;  %vm439_vm2 = vmor %vm437_vm1, %vm438_vm0  ;;  %v3558_v22 = vld [vmem:[#allocation3_spill] sm:$0xff] }
 0x13f   :  { %v444_v16 = vor.u32 1.1754944e-38, %v443_v19  ;;  %v467_v31 = vadd.f32 0.112945676, %v466_v38  ;;  %v1295_v36 = vmul.f32 %v1294_v42, %v2662_v5  ;;  %vm442_vm3 = vcmp.eq.f32.partialorder %v441_v10, 8.507059e+37 }
 0x140   :  { %3557 = vst [vmem:[#allocation2_spill] sm:$0xff] %v2726_v12  ;;  %v1548_v43 = vadd.f32 1.0, %v1781_v51  ;;  %v440_v47 = vsel %vm439_vm2, %v1845_v8, %v436_v15  ;;  %v692_v14 = vadd.f32 0.00028619796, %v691_v7  ;;  %v2730_v56 = vadd.f32 %v2640_v0, %v170_v13 }
 0x141   :  { %v445_v53 = vsel %vm442_vm3, %v444_v16, %v440_v47  ;;  %v468_v45 = vmul.f32 %v467_v31, %v2302_v37  ;;  %v2734_v41 = vmul.f32 %v1220_v21, %v2513_v59  ;;  %v1103_v63 = vadd.f32 0.001143296, %v1102_v44  ;;  %v125_v21 = vpop.f32.mrf.mxu0 }
 0x142   :  { %v1580_v17 = vmul.f32 %v1548_v43, %v3558_v22  ;;  %v446_v19 = vmul.f32 %v445_v53, %v2451_v11  ;;  %v619_v42 = vmul.f32 %v618_v62, %v2587_v30  ;;  %v1259_v8 = vmul.f32 %v1258_v25, %v2598_v60 }
 0x143   :  { %v1847_v24 = vpop.eup %1846  ;;  %v469_v10 = vadd.f32 0.4994258, %v468_v45  ;;  %v502_v38 = vmul.f32 3.8918573e-05, %v2349_v6  ;;  %v657_v7 = vmul.f32 %v656_v58, %v2628_v1  ;;  %v1104_v15 = vmul.f32 %v1103_v63, %v2316_v23  ;;  %v3559_v45 = vld [vmem:[#allocation4_spill] sm:$0xff] }
 0x144   :  { %1686 = vmatmul.f32.gmra.mxu3 %v1580_v17  ;;  %v1766_v51 = vclamps-f32 %v446_v19, 1.0  ;;  %v1073_v59 = vmul.f32 %v1847_v24, %v2717_v54  ;;  %v1296_v13 = vadd.f32 0.05243302, %v1295_v36  ;;  %v693_v11 = vmul.f32 %v692_v14, %v2712_v27 }
 0x145   :  { %v2746_v44 = vmul.f32 0.70710677, %v2730_v56  ;;  %v470_v62 = vmul.f32 %v469_v10, %v2302_v37  ;;  %v1081_v31 = vand.u32 2147483647, %v2717_v54  ;;  %v1105_v58 = vadd.f32 0.014752088, %v1104_v15 }
 0x146   :  { %v1533_v25 = vadd.f32 1.0, %v1766_v51  ;;  %v1074_v16 = vsub.f32 1.0, %v1073_v59  ;;  %v1083_v43 = vand.u32 2147483648, %v2717_v54  ;;  %v2754_v53 = vadd.f32 %v2640_v0, %v125_v21 }
 0x147   :  { %v2751_v47 = vadd.f32 1.0, %v470_v62  ;;  %v503_v36 = vadd.f32 0.001143296, %v502_v38  ;;  %vm1078_vm4 = vweird.f32 %v1847_v24  ;;  %v1106_v17 = vmul.f32 %v1105_v58, %v2316_v23 }
 0x148   :  { %v1565_v14 = vmul.f32 %v1533_v25, %v3559_v45  ;;  %v1075_v22 = vmul.f32 %v1847_v24, %v1074_v16  ;;  %v620_v37 = vadd.f32 1.1283791, %v619_v42  ;;  %v2759_v19 = vmul.f32 0.5, %v2596_v29 }
 0x149   :  { %v1329_v63 = vmul.f32 %v2746_v44, %v2746_v44  ;;  %1848 = vrcp.f32 %v2751_v47  ;;  %v1260_v10 = vadd.f32 1.1283791, %v1259_v8  ;;  %v658_v51 = vadd.f32 0.18741608, %v657_v7 }
 0x14a   :  { %3560 = vst [vmem:[#allocation3_spill] sm:$0xff] %v2759_v19  ;;  %1641 = vmatmul.f32.gmra.mxu1 %v1565_v14  ;;  %v1076_v59 = vadd.f32 %v1847_v24, %v1075_v22  ;;  %vm1077_vm5 = vweird.f32 %v2717_v54  ;;  %v1084_v38 = vor.u32 1.1754944e-38, %v1083_v43  ;;  %v2766_v21 = vmul.f32 0.70710677, %v2754_v53 }
 0x14b   :  { %vm1079_vm6 = vmor %vm1077_vm5, %vm1078_vm4  ;;  %v1107_v42 = vadd.f32 0.112945676, %v1106_v17  ;;  %v504_v29 = vmul.f32 %v503_v36, %v2349_v6  ;;  %v1297_v15 = vmul.f32 %v1296_v13, %v2662_v5  ;;  %v694_v62 = vadd.f32 0.0036580483, %v693_v11  ;;  %v173_v11 = vpop.f32.mrf.mxu2 }
 0x14c   :  { %v1080_v25 = vsel %vm1079_vm6, %v1847_v24, %v1076_v59  ;;  %vm1082_vm7 = vcmp.eq.f32.partialorder %v1081_v31, 8.507059e+37  ;;  %v2770_v8 = vmin.f32 %v1329_v63, 16.0  ;;  %v2774_v54 = vmul.f32 %v620_v37, %v2557_v57 }
 0x14d   :  { %v1085_v16 = vsel %vm1082_vm7, %v1084_v38, %v1080_v25  ;;  %v1108_v7 = vmul.f32 %v1107_v42, %v2316_v23  ;;  %v505_v58 = vadd.f32 0.014752088, %v504_v29  ;;  %v2777_v43 = vmul.f32 %v1260_v10, %v2573_v32 }
 0x14e   :  { %v2780_v45 = vmul.f32 0.5, %v2643_v33  ;;  %v1086_v13 = vmul.f32 %v1085_v16, %v2454_v2  ;;  %v729_v31 = vmul.f32 %v2766_v21, %v2766_v21  ;;  %v1142_v22 = vmul.f32 3.8918573e-05, %v2393_v48 }
 0x14f   :  { %v1849_v24 = vpop.eup %1848  ;;  %v1109_v36 = vadd.f32 0.4994258, %v1108_v7  ;;  %v506_v14 = vmul.f32 %v505_v58, %v2349_v6  ;;  %v659_v57 = vmul.f32 %v658_v51, %v2628_v1  ;;  %v1298_v17 = vadd.f32 0.18741608, %v1297_v15 }
 0x150   :  { %3561 = vst [vmem:[#allocation4_spill] sm:$0xff] %v2780_v45  ;;  %v1782_v32 = vclamps-f32 %v1086_v13, 1.0  ;;  %v473_v37 = vmul.f32 %v1849_v24, %v2751_v47  ;;  %v695_v33 = vmul.f32 %v694_v62, %v2712_v27  ;;  %v1331_v2 = vmul.f32 2.1237322e-06, %v2770_v8  ;;  %v3562_v62 = vld [vmem:[#allocation5_spill] sm:$0xff] }
 0x151   :  { %v1110_v63 = vmul.f32 %v1109_v36, %v2316_v23  ;;  %v2793_v10 = vadd.f32 %v2640_v0, %v173_v11  ;;  %v483_v42 = vand.u32 2147483648, %v2751_v47  ;;  %v507_v29 = vadd.f32 0.112945676, %v506_v14 }
 0x152   :  { %v1549_v59 = vadd.f32 1.0, %v1782_v32  ;;  %v474_v38 = vsub.f32 1.0, %v473_v37  ;;  %v481_v51 = vand.u32 2147483647, %v2751_v47  ;;  %v2797_v15 = vmin.f32 %v729_v31, 16.0 }
 0x153   :  { %v2799_v25 = vadd.f32 1.0, %v1110_v63  ;;  %v1143_v16 = vadd.f32 0.001143296, %v1142_v22  ;;  %vm478_vm8 = vweird.f32 %v1849_v24  ;;  %v508_v23 = vmul.f32 %v507_v29, %v2349_v6  ;;  %v128_v22 = vpop.f32.mrf.mxu0 }
 0x154   :  { %v1581_v7 = vmul.f32 %v1549_v59, %v3562_v62  ;;  %v475_v58 = vmul.f32 %v1849_v24, %v474_v38  ;;  %v660_v13 = vadd.f32 1.1283791, %v659_v57  ;;  %v696_v11 = vadd.f32 0.05243302, %v695_v33 }
 0x155   :  { %1850 = vrcp.f32 %v2799_v25  ;;  %v2805_v36 = vmul.f32 0.70710677, %v2793_v10  ;;  %v1332_v14 = vadd.f32 0.00028619796, %v1331_v2  ;;  %vm477_vm9 = vweird.f32 %v2751_v47 }
 0x156   :  { %1689 = vmatmul.f32.gmra.mxu3 %v1581_v7  ;;  %v476_v31 = vadd.f32 %v1849_v24, %v475_v58  ;;  %v484_v32 = vor.u32 1.1754944e-38, %v483_v42  ;;  %vm479_vm10 = vmor %vm477_vm9, %vm478_vm8  ;;  %v731_v37 = vmul.f32 2.1237322e-06, %v2797_v15  ;;  %v509_v63 = vadd.f32 0.4994258, %v508_v23 }
 0x157   :  { %v2810_v59 = vadd.f32 %v2640_v0, %v128_v22  ;;  %v1144_v57 = vmul.f32 %v1143_v16, %v2393_v48  ;;  %v1299_v33 = vmul.f32 %v1298_v17, %v2662_v5  ;;  %vm482_vm11 = vcmp.eq.f32.partialorder %v481_v51, 8.507059e+37 }
 0x158   :  { %v480_v38 = vsel %vm479_vm10, %v1849_v24, %v476_v31  ;;  %v542_v2 = vmul.f32 3.8918573e-05, %v2413_v46  ;;  %v1369_v47 = vmul.f32 %v2805_v36, %v2805_v36  ;;  %v510_v42 = vmul.f32 %v509_v63, %v2349_v6 }
 0x159   :  { %v485_v29 = vsel %vm482_vm11, %v484_v32, %v480_v38  ;;  %v2819_v62 = vmul.f32 0.70710677, %v2810_v59  ;;  %v2822_v7 = vmul.f32 %v660_v13, %v2613_v4  ;;  %v2825_v16 = vmul.f32 0.5, %v2672_v61 }
 0x15a   :  { %v1333_v24 = vmul.f32 %v1332_v14, %v2770_v8  ;;  %v486_v17 = vmul.f32 %v485_v29, %v2488_v9  ;;  %v697_v58 = vmul.f32 %v696_v11, %v2712_v27  ;;  %v732_v23 = vadd.f32 0.00028619796, %v731_v37 }
 0x15b   :  { %3563 = vst [vmem:[#allocation5_spill] sm:$0xff] %v2825_v16  ;;  %v1851_v51 = vpop.eup %1850  ;;  %v2830_v31 = vadd.f32 1.0, %v510_v42  ;;  %v1145_v6 = vadd.f32 0.014752088, %v1144_v57  ;;  %v2832_v32 = vadd.f32 1.1283791, %v1299_v33  ;;  %v769_v9 = vmul.f32 %v2819_v62, %v2819_v62 }
 0x15c   :  { %v2835_v22 = vmul.f32 0.5, %v2730_v56  ;;  %v1767_v4 = vclamps-f32 %v486_v17, 1.0  ;;  %v1113_v61 = vmul.f32 %v1851_v51, %v2799_v25  ;;  %v2838_v13 = vmin.f32 %v1369_v47, 16.0  ;;  %v3565_v47 = vld [vmem:[#allocation6_spill] sm:$0xff] }
 0x15d   :  { %1852 = vrcp.f32 %v2830_v31  ;;  %v543_v11 = vadd.f32 0.001143296, %v542_v2  ;;  %v1334_v14 = vadd.f32 0.0036580483, %v1333_v24  ;;  %v1182_v57 = vmul.f32 3.8918573e-05, %v2476_v55 }
 0x15e   :  { %3564 = vst [vmem:[#allocation13_spill] sm:$0xff] %v2835_v22  ;;  %v1534_v37 = vadd.f32 1.0, %v1767_v4  ;;  %v1114_v63 = vsub.f32 1.0, %v1113_v61  ;;  %v698_v33 = vadd.f32 0.18741608, %v697_v58  ;;  %v733_v56 = vmul.f32 %v732_v23, %v2797_v15 }
 0x15f   :  { %v1123_v38 = vand.u32 2147483648, %v2799_v25  ;;  %v1146_v29 = vmul.f32 %v1145_v6, %v2393_v48  ;;  %vm1118_vm12 = vweird.f32 %v1851_v51  ;;  %v1121_v22 = vand.u32 2147483647, %v2799_v25 }
 0x160   :  { %v1566_v42 = vmul.f32 %v1534_v37, %v3565_v47  ;;  %v1115_v17 = vmul.f32 %v1851_v51, %v1114_v63  ;;  %v1371_v2 = vmul.f32 2.1237322e-06, %v2838_v13  ;;  %v2850_v24 = vmin.f32 %v769_v9, 16.0 }
 0x161   :  { %v1147_v4 = vadd.f32 0.112945676, %v1146_v29  ;;  %v544_v61 = vmul.f32 %v543_v11, %v2413_v46  ;;  %v1335_v58 = vmul.f32 %v1334_v14, %v2770_v8  ;;  %vm1117_vm13 = vweird.f32 %v2799_v25  ;;  %v176_v29 = vpop.f32.mrf.mxu2 }
 0x162   :  { %1644 = vmatmul.f32.gmra.mxu1 %v1566_v42  ;;  %v1116_v23 = vadd.f32 %v1851_v51, %v1115_v17  ;;  %v1183_v6 = vadd.f32 0.001143296, %v1182_v57  ;;  %v734_v37 = vadd.f32 0.0036580483, %v733_v56  ;;  %vm1119_vm14 = vmor %vm1117_vm13, %vm1118_vm12  ;;  %v1124_v63 = vor.u32 1.1754944e-38, %v1123_v38  ;;  %v3566_v57 = vld [vmem:[#allocation11_spill] sm:$0xff] }
 0x163   :  { %v1853_v16 = vpop.eup %1852  ;;  %v1148_v47 = vmul.f32 %v1147_v4, %v2393_v48  ;;  %v545_v45 = vadd.f32 0.014752088, %v544_v61  ;;  %vm1122_vm15 = vcmp.eq.f32.partialorder %v1121_v22, 8.507059e+37  ;;  %v1372_v42 = vadd.f32 0.00028619796, %v1371_v2 }
 0x164   :  { %v1120_v19 = vsel %vm1119_vm14, %v1851_v51, %v1116_v23  ;;  %v513_v9 = vmul.f32 %v1853_v16, %v2830_v31  ;;  %v1184_v11 = vmul.f32 %v1183_v6, %v2476_v55  ;;  %v771_v17 = vmul.f32 2.1237322e-06, %v2850_v24 }
 0x165   :  { %v1125_v14 = vsel %vm1122_vm15, %v1124_v63, %v1120_v19  ;;  %v1149_v25 = vadd.f32 0.4994258, %v1148_v47  ;;  %v2861_v38 = vadd.f32 %v2640_v0, %v176_v29  ;;  %v546_v4 = vmul.f32 %v545_v45, %v2413_v46 }
 0x166   :  { %v1126_v12 = vmul.f32 %v1125_v14, %v3566_v57  ;;  %v514_v56 = vsub.f32 1.0, %v513_v9  ;;  %v521_v51 = vand.u32 2147483647, %v2830_v31  ;;  %v523_v22 = vand.u32 2147483648, %v2830_v31  ;;  %v3568_v57 = vld [vmem:[#allocation7_spill] sm:$0xff] }
 0x167   :  { %3567 = vst [vmem:[#allocation6_spill] sm:$0xff] %v2861_v38  ;;  %v1150_v61 = vmul.f32 %v1149_v25, %v2393_v48  ;;  %v1185_v23 = vadd.f32 0.014752088, %v1184_v11  ;;  %vm518_vm0 = vweird.f32 %v1853_v16  ;;  %v2868_v6 = vmul.f32 0.70710677, %v2861_v38 }
 0x168   :  { %v1783_v19 = vclamps-f32 %v1126_v12, 1.0  ;;  %v515_v2 = vmul.f32 %v1853_v16, %v514_v56  ;;  %v1373_v63 = vmul.f32 %v1372_v42, %v2838_v13  ;;  %vm517_vm1 = vweird.f32 %v2830_v31 }
 0x169   :  { %v772_v47 = vadd.f32 0.00028619796, %v771_v17  ;;  %v2872_v9 = vadd.f32 1.0, %v1150_v61  ;;  %v1409_v14 = vmul.f32 %v2868_v6, %v2868_v6  ;;  %v547_v48 = vadd.f32 0.112945676, %v546_v4  ;;  %vm519_vm2 = vmor %vm517_vm1, %vm518_vm0 }
 0x16a   :  { %v1550_v45 = vadd.f32 1.0, %v1783_v19  ;;  %v516_v29 = vadd.f32 %v1853_v16, %v515_v2  ;;  %v699_v12 = vmul.f32 %v698_v33, %v2712_v27  ;;  %v524_v11 = vor.u32 1.1754944e-38, %v523_v22 }
 0x16b   :  { %1854 = vrcp.f32 %v2872_v9  ;;  %v1186_v25 = vmul.f32 %v1185_v23, %v2476_v55  ;;  %v1336_v42 = vadd.f32 0.05243302, %v1335_v58  ;;  %vm522_vm3 = vcmp.eq.f32.partialorder %v521_v51, 8.507059e+37 }
 0x16c   :  { %v1582_v31 = vmul.f32 %v1550_v45, %v3568_v57  ;;  %v520_v17 = vsel %vm519_vm2, %v1853_v16, %v516_v29  ;;  %v1374_v56 = vadd.f32 0.0036580483, %v1373_v63  ;;  %v773_v19 = vmul.f32 %v772_v47, %v2850_v24  ;;  %v131_v63 = vpop.f32.mrf.mxu0 }
 0x16d   :  { %v525_v61 = vsel %vm522_vm3, %v524_v11, %v520_v17  ;;  %v2881_v2 = vmin.f32 %v1409_v14, 16.0  ;;  %v2884_v4 = vmul.f32 0.5, %v2754_v53  ;;  %v735_v33 = vmul.f32 %v734_v37, %v2797_v15 }
 0x16e   :  { %1692 = vmatmul.f32.gmra.mxu3 %v1582_v31  ;;  %v526_v22 = vmul.f32 %v525_v61, %v2549_v34  ;;  %v548_v58 = vmul.f32 %v547_v48, %v2413_v46  ;;  %v2891_v16 = vmul.f32 %v2832_v32, %v2650_v52  ;;  %v700_v51 = vadd.f32 1.1283791, %v699_v12 }
 0x16f   :  { %v1411_v23 = vmul.f32 2.1237322e-06, %v2881_v2  ;;  %v1187_v47 = vadd.f32 0.112945676, %v1186_v25  ;;  %v1337_v45 = vmul.f32 %v1336_v42, %v2770_v8  ;;  %v2896_v37 = vadd.f32 %v2640_v0, %v131_v63 }
 0x170   :  { %v1768_v53 = vclamps-f32 %v526_v22, 1.0  ;;  %v549_v29 = vadd.f32 0.4994258, %v548_v58  ;;  %v1375_v34 = vmul.f32 %v1374_v56, %v2838_v13  ;;  %v774_v48 = vadd.f32 0.0036580483, %v773_v19  ;;  %v3571_v56 = vld [vmem:[#allocation8_spill] sm:$0xff] }
 0x171   :  { %3569 = vst [vmem:[#allocation11_spill] sm:$0xff] %v2896_v37  ;;  %v1855_v14 = vpop.eup %1854  ;;  %v1412_v11 = vadd.f32 0.00028619796, %v1411_v23  ;;  %v1188_v52 = vmul.f32 %v1187_v47, %v2476_v55  ;;  %v736_v32 = vadd.f32 0.05243302, %v735_v33  ;;  %v179_v23 = vpop.f32.mrf.mxu2  ;;  %vm1157_vm5 = vweird.f32 %v2872_v9 }
 0x172   :  { %v1535_v12 = vadd.f32 1.0, %v1768_v53  ;;  %v1153_v57 = vmul.f32 %v1855_v14, %v2872_v9  ;;  %v550_v25 = vmul.f32 %v549_v29, %v2413_v46  ;;  %v2904_v31 = vmul.f32 0.70710677, %v2896_v37 }
 0x173   :  { %v1413_v42 = vmul.f32 %v1412_v11, %v2881_v2  ;;  %v582_v17 = vmul.f32 3.8918573e-05, %v2491_v26  ;;  %v1222_v61 = vmul.f32 3.8918573e-05, %v2537_v18  ;;  %v1189_v33 = vadd.f32 0.4994258, %v1188_v52 }
 0x174   :  { %3570 = vst [vmem:[#allocation7_spill] sm:$0xff] %v2904_v31  ;;  %v1567_v19 = vmul.f32 %v1535_v12, %v3571_v56  ;;  %v1154_v22 = vsub.f32 1.0, %v1153_v57  ;;  %v2909_v58 = vadd.f32 1.0, %v550_v25  ;;  %v1376_v63 = vadd.f32 0.05243302, %v1375_v34 }
 0x175   :  { %v775_v47 = vmul.f32 %v774_v48, %v2850_v24  ;;  %v1163_v46 = vand.u32 2147483648, %v2872_v9  ;;  %v2914_v53 = vadd.f32 %v2640_v0, %v179_v23  ;;  %vm1158_vm4 = vweird.f32 %v1855_v14 }
 0x176   :  { %1647 = vmatmul.f32.gmra.mxu1 %v1567_v19  ;;  %v1155_v29 = vmul.f32 %v1855_v14, %v1154_v22  ;;  %v1161_v11 = vand.u32 2147483647, %v2872_v9  ;;  %1856 = vrcp.f32 %v2909_v58  ;;  %v1414_v12 = vadd.f32 0.0036580483, %v1413_v42  ;;  %vm1159_vm6 = vmor %vm1157_vm5, %vm1158_vm4 }
 0x177   :  { %3572 = vst [vmem:[#allocation8_spill] sm:$0xff] %v2914_v53  ;;  %v1190_v52 = vmul.f32 %v1189_v33, %v2476_v55  ;;  %v583_v34 = vadd.f32 0.001143296, %v582_v17  ;;  %v809_v48 = vmul.f32 %v2904_v31, %v2904_v31  ;;  %v2923_v25 = vmul.f32 0.70710677, %v2914_v53 }
 0x178   :  { %v1156_v57 = vadd.f32 %v1855_v14, %v1155_v29  ;;  %v1223_v56 = vadd.f32 0.001143296, %v1222_v61  ;;  %v737_v19 = vmul.f32 %v736_v32, %v2797_v15  ;;  %v776_v22 = vadd.f32 0.05243302, %v775_v47 }
 0x179   :  { %3573 = vst [vmem:[#allocation14_spill] sm:$0xff] %v2923_v25  ;;  %v1164_v23 = vor.u32 1.1754944e-38, %v1163_v46  ;;  %v2926_v37 = vadd.f32 1.0, %v1190_v52  ;;  %v1338_v9 = vadd.f32 0.18741608, %v1337_v45  ;;  %v1377_v42 = vmul.f32 %v1376_v63, %v2838_v13 }
 0x17a   :  { %v1160_v55 = vsel %vm1159_vm6, %v1855_v14, %v1156_v57  ;;  %vm1162_vm7 = vcmp.eq.f32.partialorder %v1161_v11, 8.507059e+37  ;;  %v1415_v33 = vmul.f32 %v1414_v12, %v2881_v2  ;;  %v584_v29 = vmul.f32 %v583_v34, %v2491_v26 }
 0x17b   :  { %v1165_v17 = vsel %vm1162_vm7, %v1164_v23, %v1160_v55  ;;  %1858 = vrcp.f32 %v2926_v37  ;;  %v2933_v47 = vmin.f32 %v809_v48, 16.0  ;;  %v1449_v46 = vmul.f32 %v2923_v25, %v2923_v25 }
 0x17c   :  { %v1857_v61 = vpop.eup %1856  ;;  %v1166_v32 = vmul.f32 %v1165_v17, %v2590_v20  ;;  %v1224_v45 = vmul.f32 %v1223_v56, %v2537_v18  ;;  %v2939_v14 = vmul.f32 %v700_v51, %v2688_v49  ;;  %v2941_v63 = vadd.f32 0.18741608, %v737_v19 }
 0x17d   :  { %v777_v11 = vmul.f32 %v776_v22, %v2850_v24  ;;  %v553_v12 = vmul.f32 %v1857_v61, %v2909_v58  ;;  %v2946_v52 = vmul.f32 %v1338_v9, %v2770_v8  ;;  %v2948_v20 = vadd.f32 0.18741608, %v1377_v42 }
 0x17e   :  { %v1784_v34 = vclamps-f32 %v1166_v32, 1.0  ;;  %v561_v57 = vand.u32 2147483647, %v2909_v58  ;;  %v1416_v48 = vadd.f32 0.05243302, %v1415_v33  ;;  %v563_v56 = vand.u32 2147483648, %v2909_v58 }
 0x17f   :  { %v554_v23 = vsub.f32 1.0, %v553_v12  ;;  %v585_v49 = vadd.f32 0.014752088, %v584_v29  ;;  %v811_v19 = vmul.f32 2.1237322e-06, %v2933_v47  ;;  %v2953_v55 = vmin.f32 %v1449_v46, 16.0 }
 0x180   :  { %v1551_v51 = vadd.f32 1.0, %v1784_v34  ;;  %v1225_v22 = vadd.f32 0.014752088, %v1224_v45  ;;  %v778_v53 = vadd.f32 0.18741608, %v777_v11  ;;  %vm558_vm8 = vweird.f32 %v1857_v61  ;;  %v3574_v32 = vld [vmem:[#allocation9_spill] sm:$0xff] }
 0x181   :  { %v1859_v17 = vpop.eup %1858  ;;  %v555_v9 = vmul.f32 %v1857_v61, %v554_v23  ;;  %v586_v42 = vmul.f32 %v585_v49, %v2491_v26  ;;  %vm557_vm9 = vweird.f32 %v2909_v58  ;;  %vm2958_vm10 = vcmp.eq.f32.partialorder %v561_v57, 8.507059e+37 }
 0x182   :  { %v1583_v25 = vmul.f32 %v1551_v51, %v3574_v32  ;;  %v1193_v29 = vmul.f32 %v1859_v17, %v2926_v37  ;;  %v1417_v46 = vmul.f32 %v1416_v48, %v2881_v2  ;;  %v564_v45 = vor.u32 1.1754944e-38, %v563_v56  ;;  %vm559_vm11 = vmor %vm557_vm9, %vm558_vm8 }
 0x183   :  { %v556_v12 = vadd.f32 %v1857_v61, %v555_v9  ;;  %v587_v34 = vadd.f32 0.112945676, %v586_v42  ;;  %v812_v11 = vadd.f32 0.00028619796, %v811_v19  ;;  %v1451_v49 = vmul.f32 2.1237322e-06, %v2953_v55 }
 0x184   :  { %1695 = vmatmul.f32.gmra.mxu3 %v1583_v25  ;;  %v1194_v23 = vsub.f32 1.0, %v1193_v29  ;;  %v1226_v51 = vmul.f32 %v1225_v22, %v2537_v18  ;;  %v1201_v57 = vand.u32 2147483647, %v2926_v37  ;;  %v1203_v32 = vand.u32 2147483648, %v2926_v37  ;;  %v134_v25 = vpop.f32.mrf.mxu0 }
 0x185   :  { %v560_v58 = vsel %vm559_vm11, %v1857_v61, %v556_v12  ;;  %v588_v31 = vmul.f32 %v587_v34, %v2491_v26  ;;  %vm1198_vm12 = vweird.f32 %v1859_v17  ;;  %vm1197_vm13 = vweird.f32 %v2926_v37 }
 0x186   :  { %v565_v48 = vsel %vm2958_vm10, %v564_v45, %v560_v58  ;;  %v1195_v56 = vmul.f32 %v1859_v17, %v1194_v23  ;;  %v1227_v9 = vadd.f32 0.112945676, %v1226_v51  ;;  %v2974_v61 = vadd.f32 %v2640_v0, %v134_v25  ;;  %vm1199_vm14 = vmor %vm1197_vm13, %vm1198_vm12 }
 0x187   :  { %v566_v19 = vmul.f32 %v565_v48, %v2667_v39  ;;  %v589_v42 = vadd.f32 0.4994258, %v588_v31  ;;  %v1418_v22 = vadd.f32 0.18741608, %v1417_v46  ;;  %v1452_v12 = vadd.f32 0.00028619796, %v1451_v49 }
 0x188   :  { %3577 = vst [vmem:[#allocation9_spill] sm:$0xff] %v2974_v61  ;;  %v1196_v29 = vadd.f32 %v1859_v17, %v1195_v56  ;;  %v1228_v34 = vmul.f32 %v1227_v9, %v2537_v18  ;;  %v1204_v33 = vor.u32 1.1754944e-38, %v1203_v32  ;;  %v622_v23 = vmul.f32 3.8918573e-05, %v2587_v30  ;;  %v3579_v56 = vld [vmem:[#allocation10_spill] sm:$0xff] }
 0x189   :  { %v1769_v38 = vclamps-f32 %v566_v19, 1.0  ;;  %v590_v45 = vmul.f32 %v589_v42, %v2491_v26  ;;  %vm1202_vm15 = vcmp.eq.f32.partialorder %v1201_v57, 8.507059e+37  ;;  %v2980_v39 = vmul.f32 0.70710677, %v2974_v61  ;;  %v182_v42 = vpop.f32.mrf.mxu2 }
 0x18a   :  { %v1200_v51 = vsel %vm1199_vm14, %v1859_v17, %v1196_v29  ;;  %v1229_v37 = vadd.f32 0.4994258, %v1228_v34  ;;  %v813_v46 = vmul.f32 %v812_v11, %v2933_v47  ;;  %v1453_v32 = vmul.f32 %v1452_v12, %v2953_v55 }
 0x18b   :  { %3578 = vst [vmem:[#allocation15_spill] sm:$0xff] %v2980_v39  ;;  %v1536_v31 = vadd.f32 1.0, %v1769_v38  ;;  %v1205_v58 = vsel %vm1202_vm15, %v1204_v33, %v1200_v51  ;;  %v2983_v49 = vadd.f32 1.0, %v590_v45  ;;  %v849_v26 = vmul.f32 %v2980_v39, %v2980_v39 }
 0x18c   :  { %v1206_v48 = vmul.f32 %v1205_v58, %v2684_v28  ;;  %v1230_v17 = vmul.f32 %v1229_v37, %v2537_v18  ;;  %v1340_v57 = vadd.f32 1.1283791, %v2946_v52  ;;  %v623_v38 = vadd.f32 0.001143296, %v622_v23 }
 0x18d   :  { %v1568_v25 = vmul.f32 %v1536_v31, %v3579_v56  ;;  %1860 = vrcp.f32 %v2983_v49  ;;  %v739_v11 = vmul.f32 %v2941_v63, %v2797_v15  ;;  %v1379_v28 = vmul.f32 %v2948_v20, %v2838_v13 }
 0x18e   :  { %v779_v9 = vmul.f32 %v778_v53, %v2850_v24  ;;  %v1785_v19 = vclamps-f32 %v1206_v48, 1.0  ;;  %v1419_v29 = vmul.f32 %v1418_v22, %v2881_v2  ;;  %v814_v18 = vadd.f32 0.0036580483, %v813_v46 }
 0x18f   :  { %1650 = vmatmul.f32.gmra.mxu1 %v1568_v25  ;;  %v2999_v52 = vmin.f32 %v849_v26, 16.0  ;;  %v3001_v12 = vadd.f32 1.0, %v1230_v17  ;;  %v3004_v34 = vmul.f32 0.5, %v2793_v10  ;;  %v1454_v63 = vadd.f32 0.0036580483, %v1453_v32 }
 0x190   :  { %v1552_v33 = vadd.f32 1.0, %v1785_v19  ;;  %v601_v45 = vand.u32 2147483647, %v2983_v49  ;;  %v3009_v53 = vadd.f32 %v2640_v0, %v182_v42  ;;  %v624_v20 = vmul.f32 %v623_v38, %v2587_v30 }
 0x191   :  { %1862 = vrcp.f32 %v3001_v12  ;;  %v1262_v22 = vmul.f32 3.8918573e-05, %v2598_v60  ;;  %v3013_v23 = vadd.f32 1.1283791, %v739_v11  ;;  %v3015_v51 = vadd.f32 1.1283791, %v1379_v28 }
 0x192   :  { %3580 = vst [vmem:[#allocation10_spill] sm:$0xff] %v3009_v53  ;;  %v1584_v10 = vmul.f32 %v1552_v33, %v2578_v50  ;;  %v603_v37 = vand.u32 2147483648, %v2983_v49  ;;  %v3020_v46 = vmul.f32 %v1340_v57, %v2746_v44  ;;  %v3022_v58 = vadd.f32 1.1283791, %v779_v9 }
 0x193   :  { %v1861_v31 = vpop.eup %1860  ;;  %v3024_v0 = vadd.f32 1.1283791, %v1419_v29  ;;  %v851_v48 = vmul.f32 2.1237322e-06, %v2999_v52  ;;  %v3028_v32 = vmul.f32 %v814_v18, %v2933_v47  ;;  %v3031_v26 = vmul.f32 %v1454_v63, %v2953_v55 }
 0x194   :  { %1698 = vmatmul.f32.gmra.mxu3 %v1584_v10  ;;  %v593_v50 = vmul.f32 %v1861_v31, %v2983_v49  ;;  %vm3034_vm0 = vcmp.eq.f32.partialorder %v601_v45, 8.507059e+37  ;;  %vm597_vm1 = vweird.f32 %v2983_v49  ;;  %v3040_v44 = vmul.f32 0.70710677, %v3009_v53 }
 0x195   :  { %v625_v57 = vadd.f32 0.014752088, %v624_v20  ;;  %v1263_v56 = vadd.f32 0.001143296, %v1262_v22  ;;  %v604_v38 = vor.u32 1.1754944e-38, %v603_v37  ;;  %vm1237_vm2 = vweird.f32 %v3001_v12 }
 0x196   :  { %3583 = vst [vmem:[#allocation16_spill] sm:$0xff] %v3040_v44  ;;  %v594_v25 = vsub.f32 1.0, %v593_v50  ;;  %v662_v11 = vmul.f32 3.8918573e-05, %v2628_v1  ;;  %v1302_v28 = vmul.f32 3.8918573e-05, %v2662_v5  ;;  %vm598_vm3 = vweird.f32 %v1861_v31 }
 0x197   :  { %v1863_v9 = vpop.eup %1862  ;;  %v852_v19 = vadd.f32 0.00028619796, %v851_v48  ;;  %v626_v42 = vmul.f32 %v625_v57, %v2587_v30  ;;  %v1264_v29 = vmul.f32 %v1263_v56, %v2598_v60  ;;  %v1241_v45 = vand.u32 2147483647, %v3001_v12  ;;  %vm599_vm4 = vmor %vm597_vm1, %vm598_vm3 }
 0x198   :  { %v595_v18 = vmul.f32 %v1861_v31, %v594_v25  ;;  %v1233_v33 = vmul.f32 %v1863_v9, %v3001_v12  ;;  %v663_v63 = vadd.f32 0.001143296, %v662_v11  ;;  %v1489_v20 = vmul.f32 %v3040_v44, %v3040_v44 }
 0x199   :  { %v627_v22 = vadd.f32 0.112945676, %v626_v42  ;;  %v1265_v10 = vadd.f32 0.014752088, %v1264_v29  ;;  %v1303_v53 = vadd.f32 0.001143296, %v1302_v28  ;;  %v853_v57 = vmul.f32 %v852_v19, %v2999_v52 }
 0x19a   :  { %v596_v37 = vadd.f32 %v1861_v31, %v595_v18  ;;  %v1234_v48 = vsub.f32 1.0, %v1233_v33  ;;  %v664_v50 = vmul.f32 %v663_v63, %v2628_v1  ;;  %v1243_v56 = vand.u32 2147483648, %v3001_v12 }
 0x19b   :  { %v628_v25 = vmul.f32 %v627_v22, %v2587_v30  ;;  %v1266_v11 = vmul.f32 %v1265_v10, %v2598_v60  ;;  %vm1238_vm5 = vweird.f32 %v1863_v9  ;;  %v3060_v18 = vmin.f32 %v1489_v20, 16.0 }
 0x19c   :  { %v600_v61 = vsel %vm599_vm4, %v1861_v31, %v596_v37  ;;  %v1235_v44 = vmul.f32 %v1863_v9, %v1234_v48  ;;  %v665_v42 = vadd.f32 0.014752088, %v664_v50  ;;  %v1304_v49 = vmul.f32 %v1303_v53, %v2662_v5  ;;  %vm1239_vm6 = vmor %vm1237_vm2, %vm1238_vm5 }
 0x19d   :  { %v605_v29 = vsel %vm3034_vm0, %v604_v38, %v600_v61  ;;  %v629_v28 = vadd.f32 0.4994258, %v628_v25  ;;  %v1267_v63 = vadd.f32 0.112945676, %v1266_v11  ;;  %v854_v39 = vadd.f32 0.0036580483, %v853_v57 }
 0x19e   :  { %v606_v19 = vmul.f32 %v605_v29, %v2697_v40  ;;  %v1236_v33 = vadd.f32 %v1863_v9, %v1235_v44  ;;  %v666_v22 = vmul.f32 %v665_v42, %v2628_v1  ;;  %vm1242_vm7 = vcmp.eq.f32.partialorder %v1241_v45, 8.507059e+37  ;;  %v3584_v25 = vld [vmem:[#allocation12_spill] sm:$0xff] }
 0x19f   :  { %v1244_v31 = vor.u32 1.1754944e-38, %v1243_v56  ;;  %v630_v17 = vmul.f32 %v629_v28, %v2587_v30  ;;  %v1268_v20 = vmul.f32 %v1267_v63, %v2598_v60  ;;  %v1491_v40 = vmul.f32 2.1237322e-06, %v3060_v18 }
 0x1a0   :  { %v1770_v61 = vclamps-f32 %v606_v19, 1.0  ;;  %v1240_v38 = vsel %vm1239_vm6, %v1863_v9, %v1236_v33  ;;  %v667_v10 = vadd.f32 0.112945676, %v666_v22  ;;  %v1305_v37 = vadd.f32 0.014752088, %v1304_v49 }
 0x1a1   :  { %v1245_v53 = vsel %vm1242_vm7, %v1244_v31, %v1240_v38  ;;  %v3070_v44 = vadd.f32 1.0, %v630_v17  ;;  %v1269_v12 = vadd.f32 0.4994258, %v1268_v20  ;;  %v3076_v30 = vmul.f32 %v3013_v23, %v2766_v21 }
 0x1a2   :  { %v1537_v48 = vadd.f32 1.0, %v1770_v61  ;;  %v1246_v50 = vmul.f32 %v1245_v53, %v2734_v41  ;;  %v668_v45 = vmul.f32 %v667_v10, %v2628_v1  ;;  %v3079_v9 = vmul.f32 0.5, %v2810_v59 }
 0x1a3   :  { %v816_v57 = vadd.f32 0.05243302, %v3028_v32  ;;  %1864 = vrcp.f32 %v3070_v44  ;;  %v3085_v56 = vmul.f32 %v3015_v51, %v2805_v36  ;;  %v1456_v41 = vadd.f32 0.05243302, %v3031_v26 }
 0x1a4   :  { %v1569_v11 = vmul.f32 %v1537_v48, %v3584_v25  ;;  %v1786_v42 = vclamps-f32 %v1246_v50, 1.0  ;;  %v855_v29 = vmul.f32 %v854_v39, %v2999_v52  ;;  %v1492_v21 = vadd.f32 0.00028619796, %v1491_v40 }
 0x1a5   :  { %v1270_v23 = vmul.f32 %v1269_v12, %v2598_v60  ;;  %v669_v59 = vadd.f32 0.4994258, %v668_v45  ;;  %v3093_v32 = vmul.f32 %v3022_v58, %v2819_v62  ;;  %v3097_v28 = vmul.f32 %v3024_v0, %v2868_v6 }
 0x1a6   :  { %1653 = vmatmul.f32.gmra.mxu1 %v1569_v11  ;;  %v1553_v36 = vadd.f32 1.0, %v1786_v42  ;;  %v1306_v51 = vmul.f32 %v1305_v37, %v2662_v5  ;;  %v3101_v26 = vmul.f32 %v816_v57, %v2933_v47  ;;  %v702_v49 = vmul.f32 3.8918573e-05, %v2712_v27 }
 0x1a7   :  { %v3103_v39 = vadd.f32 1.0, %v1270_v23  ;;  %v670_v60 = vmul.f32 %v669_v59, %v2628_v1  ;;  %v3108_v62 = vmul.f32 %v1456_v41, %v2953_v55  ;;  %v641_v6 = vand.u32 2147483647, %v3070_v44 }
 0x1a8   :  { %v1585_v58 = vmul.f32 %v1553_v36, %v2680_v35  ;;  %v1307_v0 = vadd.f32 0.112945676, %v1306_v51  ;;  %v3112_v33 = vadd.f32 0.05243302, %v855_v29  ;;  %v3115_v63 = vmul.f32 %v1492_v21, %v3060_v18 }
 0x1a9   :  { %v1865_v19 = vpop.eup %1864  ;;  %v643_v22 = vand.u32 2147483648, %v3070_v44  ;;  %1866 = vrcp.f32 %v3103_v39  ;;  %v3120_v31 = vadd.f32 1.0, %v670_v60  ;;  %v1342_v35 = vmul.f32 3.8918573e-05, %v2770_v8 }
 0x1aa   :  { %1701 = vmatmul.f32.gmra.mxu3 %v1585_v58  ;;  %v633_v1 = vmul.f32 %v1865_v19, %v3070_v44  ;;  %v742_v17 = vmul.f32 3.8918573e-05, %v2797_v15  ;;  %vm637_vm8 = vweird.f32 %v3070_v44  ;;  %v1283_v61 = vand.u32 2147483648, %v3103_v39 }
 0x1ab   :  { %v1308_v38 = vmul.f32 %v1307_v0, %v2662_v5  ;;  %v703_v20 = vadd.f32 0.001143296, %v702_v49  ;;  %vm3127_vm9 = vcmp.eq.f32.partialorder %v641_v6, 8.507059e+37  ;;  %v1281_v40 = vand.u32 2147483647, %v3103_v39 }
 0x1ac   :  { %v634_v10 = vsub.f32 1.0, %v633_v1  ;;  %1868 = vrcp.f32 %v3120_v31  ;;  %vm638_vm10 = vweird.f32 %v1865_v19  ;;  %v644_v37 = vor.u32 1.1754944e-38, %v643_v22 }
 0x1ad   :  { %v683_v48 = vand.u32 2147483648, %v3120_v31  ;;  %v1309_v50 = vadd.f32 0.4994258, %v1308_v38  ;;  %v704_v45 = vmul.f32 %v703_v20, %v2712_v27  ;;  %v1343_v57 = vadd.f32 0.001143296, %v1342_v35  ;;  %vm639_vm13 = vmor %vm637_vm8, %vm638_vm10 }
 0x1ae   :  { %v635_v12 = vmul.f32 %v1865_v19, %v634_v10  ;;  %v743_v41 = vadd.f32 0.001143296, %v742_v17  ;;  %vm1277_vm11 = vweird.f32 %v3103_v39  ;;  %v1284_v11 = vor.u32 1.1754944e-38, %v1283_v61 }
 0x1af   :  { %v1867_v25 = vpop.eup %1866  ;;  %v681_v42 = vand.u32 2147483647, %v3120_v31  ;;  %v1310_v29 = vmul.f32 %v1309_v50, %v2662_v5  ;;  %vm3139_vm12 = vcmp.eq.f32.partialorder %v1281_v40, 8.507059e+37  ;;  %v705_v36 = vadd.f32 0.014752088, %v704_v45 }
 0x1b0   :  { %v636_v21 = vadd.f32 %v1865_v19, %v635_v12  ;;  %v1273_v23 = vmul.f32 %v1867_v25, %v3103_v39  ;;  %v1382_v51 = vmul.f32 3.8918573e-05, %v2838_v13  ;;  %vm677_vm14 = vweird.f32 %v3120_v31 }
 0x1b1   :  { %v684_v60 = vor.u32 1.1754944e-38, %v683_v48  ;;  %v3148_v49 = vadd.f32 1.0, %v1310_v29  ;;  %v1344_v5 = vmul.f32 %v1343_v57, %v2770_v8  ;;  %v706_v22 = vmul.f32 %v705_v36, %v2712_v27 }
 0x1b2   :  { %v1869_v58 = vpop.eup %1868  ;;  %v640_v6 = vsel %vm639_vm13, %v1865_v19, %v636_v21  ;;  %v1274_v0 = vsub.f32 1.0, %v1273_v23  ;;  %v744_v1 = vmul.f32 %v743_v41, %v2797_v15  ;;  %vm1278_vm15 = vweird.f32 %v1867_v25 }
 0x1b3   :  { %v645_v35 = vsel %vm3127_vm9, %v644_v37, %v640_v6  ;;  %v673_v44 = vmul.f32 %v1869_v58, %v3120_v31  ;;  %vm3156_vm0 = vcmp.eq.f32.partialorder %v681_v42, 8.507059e+37  ;;  %1870 = vrcp.f32 %v3148_v49  ;;  %vm1279_vm2 = vmor %vm1277_vm11, %vm1278_vm15 }
 0x1b4   :  { %v646_v61 = vmul.f32 %v645_v35, %v2774_v54  ;;  %v1275_v19 = vmul.f32 %v1867_v25, %v1274_v0  ;;  %v1383_v38 = vadd.f32 0.001143296, %v1382_v51  ;;  %v782_v20 = vmul.f32 3.8918573e-05, %v2850_v24 }
 0x1b5   :  { %v674_v10 = vsub.f32 1.0, %v673_v44  ;;  %vm678_vm1 = vweird.f32 %v1869_v58  ;;  %v707_v40 = vadd.f32 0.112945676, %v706_v22  ;;  %v1345_v53 = vadd.f32 0.014752088, %v1344_v5 }
 0x1b6   :  { %v1771_v37 = vclamps-f32 %v646_v61, 1.0  ;;  %v1276_v48 = vadd.f32 %v1867_v25, %v1275_v19  ;;  %v1321_v50 = vand.u32 2147483647, %v3148_v49  ;;  %v745_v12 = vadd.f32 0.014752088, %v744_v1  ;;  %vm679_vm3 = vmor %vm677_vm14, %vm678_vm1 }
 0x1b7   :  { %v675_v45 = vmul.f32 %v1869_v58, %v674_v10  ;;  %v1323_v54 = vand.u32 2147483648, %v3148_v49  ;;  %v708_v57 = vmul.f32 %v707_v40, %v2712_v27  ;;  %v1346_v41 = vmul.f32 %v1345_v53, %v2770_v8 }
 0x1b8   :  { %v1538_v42 = vadd.f32 1.0, %v1771_v37  ;;  %v1280_v29 = vsel %vm1279_vm2, %v1867_v25, %v1276_v48  ;;  %v746_v21 = vmul.f32 %v745_v12, %v2797_v15  ;;  %v1384_v23 = vmul.f32 %v1383_v38, %v2838_v13 }
 0x1b9   :  { %v1871_v36 = vpop.eup %1870  ;;  %v1285_v51 = vsel %vm3139_vm12, %v1284_v11, %v1280_v29  ;;  %v676_v5 = vadd.f32 %v1869_v58, %v675_v45  ;;  %v709_v39 = vadd.f32 0.4994258, %v708_v57  ;;  %v1347_v6 = vadd.f32 0.112945676, %v1346_v41 }
 0x1ba   :  { %v1570_v0 = vmul.f32 %v1538_v42, %v2693_v3  ;;  %v1286_v22 = vmul.f32 %v1285_v51, %v2777_v43  ;;  %v1313_v25 = vmul.f32 %v1871_v36, %v3148_v49  ;;  %vm1318_vm4 = vweird.f32 %v1871_v36 }
 0x1bb   :  { %v680_v1 = vsel %vm679_vm3, %v1869_v58, %v676_v5  ;;  %v710_v35 = vmul.f32 %v709_v39, %v2712_v27  ;;  %v1348_v59 = vmul.f32 %v1347_v6, %v2770_v8  ;;  %v747_v11 = vadd.f32 0.112945676, %v746_v21 }
 0x1bc   :  { %1656 = vmatmul.f32.gmra.mxu1 %v1570_v0  ;;  %v1787_v44 = vclamps-f32 %v1286_v22, 1.0  ;;  %v685_v3 = vsel %vm3156_vm0, %v684_v60, %v680_v1  ;;  %v1314_v61 = vsub.f32 1.0, %v1313_v25  ;;  %v1385_v43 = vadd.f32 0.014752088, %v1384_v23  ;;  %v3594_v23 = vld [vmem:[#allocation3_spill] sm:$0xff] }
 0x1bd   :  { %v686_v19 = vmul.f32 %v685_v3, %v2822_v7  ;;  %v3185_v31 = vadd.f32 1.0, %v710_v35  ;;  %v1349_v38 = vadd.f32 0.4994258, %v1348_v59  ;;  %v748_v10 = vmul.f32 %v747_v11, %v2797_v15  ;;  %v3593_v7 = vld [vmem:[#allocation2_spill] sm:$0xff] }
 0x1be   :  { %v1554_v58 = vadd.f32 1.0, %v1787_v44  ;;  %v1315_v40 = vmul.f32 %v1871_v36, %v1314_v61  ;;  %v1386_v27 = vmul.f32 %v1385_v43, %v2838_v13  ;;  %v783_v53 = vadd.f32 0.001143296, %v782_v20 }
 0x1bf   :  { %v1772_v37 = vclamps-f32 %v686_v19, 1.0  ;;  %vm1317_vm5 = vweird.f32 %v3148_v49  ;;  %vm3190_vm6 = vcmp.eq.f32.partialorder %v1321_v50, 8.507059e+37  ;;  %1872 = vrcp.f32 %v3185_v31 }
 0x1c0   :  { %v1586_v60 = vmul.f32 %v1554_v58, %v3593_v7  ;;  %v1316_v48 = vadd.f32 %v1871_v36, %v1315_v40  ;;  %v721_v12 = vand.u32 2147483647, %v3185_v31  ;;  %v1350_v45 = vmul.f32 %v1349_v38, %v2770_v8  ;;  %vm1319_vm7 = vmor %vm1317_vm5, %vm1318_vm4 }
 0x1c1   :  { %v1539_v57 = vadd.f32 1.0, %v1772_v37  ;;  %v1324_v20 = vor.u32 1.1754944e-38, %v1323_v54  ;;  %v749_v41 = vadd.f32 0.4994258, %v748_v10  ;;  %v1387_v42 = vadd.f32 0.112945676, %v1386_v27 }
 0x1c2   :  { %1704 = vmatmul.f32.gmra.mxu3 %v1586_v60  ;;  %v1320_v49 = vsel %vm1319_vm7, %v1871_v36, %v1316_v48  ;;  %v723_v50 = vand.u32 2147483648, %v3185_v31  ;;  %v3200_v29 = vadd.f32 1.0, %v1350_v45  ;;  %v784_v21 = vmul.f32 %v783_v53, %v2850_v24  ;;  %v3597_v10 = vld [vmem:[#allocation4_spill] sm:$0xff] }
 0x1c3   :  { %v1571_v51 = vmul.f32 %v1539_v57, %v3594_v23  ;;  %v1325_v5 = vsel %vm3190_vm6, %v1324_v20, %v1320_v49  ;;  %v750_v8 = vmul.f32 %v749_v41, %v2797_v15  ;;  %v1388_v39 = vmul.f32 %v1387_v42, %v2838_v13 }
 0x1c4   :  { %v3209_v54 = vadd.f32 0.18741608, %v3101_v26  ;;  %v3212_v36 = vadd.f32 0.18741608, %v3108_v62  ;;  %v1326_v6 = vmul.f32 %v1325_v5, %v2891_v16  ;;  %1874 = vrcp.f32 %v3200_v29 }
 0x1c5   :  { %v1873_v0 = vpop.eup %1872  ;;  %v3218_v22 = vmul.f32 %v3112_v33, %v2999_v52  ;;  %1659 = vmatmul.f32.gmra.mxu1 %v1571_v51  ;;  %v3220_v25 = vadd.f32 1.0, %v750_v8  ;;  %v1389_v15 = vadd.f32 0.4994258, %v1388_v39  ;;  %v785_v1 = vadd.f32 0.014752088, %v784_v21 }
 0x1c6   :  { %v3223_v26 = vadd.f32 0.0036580483, %v3115_v63  ;;  %v1788_v35 = vclamps-f32 %v1326_v6, 1.0  ;;  %v713_v62 = vmul.f32 %v1873_v0, %v3185_v31  ;;  %vm717_vm8 = vweird.f32 %v3185_v31 }
 0x1c7   :  { %vm3227_vm9 = vcmp.eq.f32.partialorder %v721_v12, 8.507059e+37  ;;  %v724_v59 = vor.u32 1.1754944e-38, %v723_v50  ;;  %v1361_v33 = vand.u32 2147483647, %v3200_v29  ;;  %1876 = vrcp.f32 %v3220_v25 }
 0x1c8   :  { %v1555_v11 = vadd.f32 1.0, %v1788_v35  ;;  %v714_v44 = vsub.f32 1.0, %v713_v62  ;;  %v1363_v3 = vand.u32 2147483648, %v3200_v29  ;;  %v1390_v63 = vmul.f32 %v1389_v15, %v2838_v13 }
 0x1c9   :  { %vm718_vm10 = vweird.f32 %v1873_v0  ;;  %vm1357_vm11 = vweird.f32 %v3200_v29  ;;  %v761_v61 = vand.u32 2147483647, %v3220_v25  ;;  %v786_v43 = vmul.f32 %v785_v1, %v2850_v24 }
 0x1ca   :  { %v1422_v19 = vmul.f32 3.8918573e-05, %v2881_v2  ;;  %v1875_v38 = vpop.eup %1874  ;;  %v1587_v58 = vmul.f32 %v1555_v11, %v3597_v10  ;;  %v715_v40 = vmul.f32 %v1873_v0, %v714_v44  ;;  %v763_v27 = vand.u32 2147483648, %v3220_v25  ;;  %vm719_vm13 = vmor %vm717_vm8, %vm718_vm10  ;;  %v3602_v10 = vld [vmem:[#allocation5_spill] sm:$0xff] }
 0x1cb   :  { %v3241_v53 = vadd.f32 1.0, %v1390_v63  ;;  %v1353_v37 = vmul.f32 %v1875_v38, %v3200_v29  ;;  %vm3244_vm12 = vcmp.eq.f32.partialorder %v1361_v33, 8.507059e+37  ;;  %v787_v17 = vadd.f32 0.112945676, %v786_v43 }
 0x1cc   :  { %v1423_v7 = vadd.f32 0.001143296, %v1422_v19  ;;  %1707 = vmatmul.f32.gmra.mxu3 %v1587_v58  ;;  %v716_v60 = vadd.f32 %v1873_v0, %v715_v40  ;;  %v1364_v48 = vor.u32 1.1754944e-38, %v1363_v3  ;;  %v822_v12 = vmul.f32 3.8918573e-05, %v2933_v47 }
 0x1cd   :  { %1878 = vrcp.f32 %v3241_v53  ;;  %v1877_v45 = vpop.eup %1876  ;;  %v1354_v57 = vsub.f32 1.0, %v1353_v37  ;;  %vm757_vm14 = vweird.f32 %v3220_v25  ;;  %v788_v20 = vmul.f32 %v787_v17, %v2850_v24 }
 0x1ce   :  { %v1424_v41 = vmul.f32 %v1423_v7, %v2881_v2  ;;  %v720_v42 = vsel %vm719_vm13, %v1873_v0, %v716_v60  ;;  %v753_v49 = vmul.f32 %v1877_v45, %v3220_v25  ;;  %vm3257_vm15 = vcmp.eq.f32.partialorder %v761_v61, 8.507059e+37 }
 0x1cf   :  { %v764_v21 = vor.u32 1.1754944e-38, %v763_v27  ;;  %v725_v23 = vsel %vm3227_vm9, %v724_v59, %v720_v42  ;;  %v1355_v31 = vmul.f32 %v1875_v38, %v1354_v57  ;;  %vm1358_vm0 = vweird.f32 %v1875_v38 }
 0x1d0   :  { %v789_v51 = vadd.f32 0.4994258, %v788_v20  ;;  %v726_v5 = vmul.f32 %v725_v23, %v2939_v14  ;;  %v754_v8 = vsub.f32 1.0, %v753_v49  ;;  %v1425_v39 = vadd.f32 0.014752088, %v1424_v41  ;;  %vm1359_vm2 = vmor %vm1357_vm11, %vm1358_vm0 }
 0x1d1   :  { %v823_v6 = vadd.f32 0.001143296, %v822_v12  ;;  %v1356_v15 = vadd.f32 %v1875_v38, %v1355_v31  ;;  %vm1397_vm1 = vweird.f32 %v3241_v53  ;;  %v1401_v0 = vand.u32 2147483647, %v3241_v53 }
 0x1d2   :  { %v1403_v1 = vand.u32 2147483648, %v3241_v53  ;;  %v790_v35 = vmul.f32 %v789_v51, %v2850_v24  ;;  %v1773_v16 = vclamps-f32 %v726_v5, 1.0  ;;  %v755_v59 = vmul.f32 %v1877_v45, %v754_v8 }
 0x1d3   :  { %v1879_v62 = vpop.eup %1878  ;;  %vm758_vm3 = vweird.f32 %v1877_v45  ;;  %v1426_v14 = vmul.f32 %v1425_v39, %v2881_v2  ;;  %v1360_v33 = vsel %vm1359_vm2, %v1875_v38, %v1356_v15  ;;  %v824_v3 = vmul.f32 %v823_v6, %v2933_v47 }
 0x1d4   :  { %v1393_v11 = vmul.f32 %v1879_v62, %v3241_v53  ;;  %v3272_v44 = vadd.f32 1.0, %v790_v35  ;;  %v1540_v63 = vadd.f32 1.0, %v1773_v16  ;;  %v1365_v24 = vsel %vm3244_vm12, %v1364_v48, %v1360_v33  ;;  %vm759_vm4 = vmor %vm757_vm14, %vm758_vm3 }
 0x1d5   :  { %v756_v61 = vadd.f32 %v1877_v45, %v755_v59  ;;  %v1427_v43 = vadd.f32 0.112945676, %v1426_v14  ;;  %v1366_v29 = vmul.f32 %v1365_v24, %v3020_v46  ;;  %v1462_v38 = vmul.f32 3.8918573e-05, %v2953_v55 }
 0x1d6   :  { %v1394_v19 = vsub.f32 1.0, %v1393_v11  ;;  %1880 = vrcp.f32 %v3272_v44  ;;  %v1572_v58 = vmul.f32 %v1540_v63, %v3602_v10  ;;  %vm1398_vm5 = vweird.f32 %v1879_v62 }
 0x1d7   :  { %v760_v40 = vsel %vm759_vm4, %v1877_v45, %v756_v61  ;;  %v862_v27 = vmul.f32 3.8918573e-05, %v2999_v52  ;;  %v1789_v37 = vclamps-f32 %v1366_v29, 1.0  ;;  %v1428_v46 = vmul.f32 %v1427_v43, %v2881_v2  ;;  %vm1399_vm7 = vmor %vm1397_vm1, %vm1398_vm5 }
 0x1d8   :  { %v765_v13 = vsel %vm3257_vm15, %v764_v21, %v760_v40  ;;  %v1395_v17 = vmul.f32 %v1879_v62, %v1394_v19  ;;  %1662 = vmatmul.f32.gmra.mxu1 %v1572_v58  ;;  %vm3288_vm6 = vcmp.eq.f32.partialorder %v1401_v0, 8.507059e+37  ;;  %v1404_v60 = vor.u32 1.1754944e-38, %v1403_v1  ;;  %v3605_v21 = vld [vmem:[#allocation13_spill] sm:$0xff] }
 0x1d9   :  { %v766_v25 = vmul.f32 %v765_v13, %v3076_v30  ;;  %v825_v48 = vadd.f32 0.014752088, %v824_v3  ;;  %v1556_v12 = vadd.f32 1.0, %v1789_v37  ;;  %v1429_v57 = vadd.f32 0.4994258, %v1428_v46 }
 0x1da   :  { %v1396_v45 = vadd.f32 %v1879_v62, %v1395_v17  ;;  %v1463_v20 = vadd.f32 0.001143296, %v1462_v38  ;;  %v863_v49 = vadd.f32 0.001143296, %v862_v27  ;;  %v1502_v30 = vmul.f32 3.8918573e-05, %v3060_v18 }
 0x1db   :  { %v1774_v41 = vclamps-f32 %v766_v25, 1.0  ;;  %v826_v42 = vmul.f32 %v825_v48, %v2933_v47  ;;  %v1588_v23 = vmul.f32 %v1556_v12, %v3605_v21  ;;  %v1430_v51 = vmul.f32 %v1429_v57, %v2881_v2 }
 0x1dc   :  { %v1881_v50 = vpop.eup %1880  ;;  %v1400_v31 = vsel %vm1399_vm7, %v1879_v62, %v1396_v45  ;;  %v1464_v5 = vmul.f32 %v1463_v20, %v2953_v55  ;;  %v1495_v8 = vmul.f32 %v3223_v26, %v3060_v18  ;;  %v864_v16 = vmul.f32 %v863_v49, %v2999_v52 }
 0x1dd   :  { %v1541_v39 = vadd.f32 1.0, %v1774_v41  ;;  %v1405_v53 = vsel %vm3288_vm6, %v1404_v60, %v1400_v31  ;;  %v793_v6 = vmul.f32 %v1881_v50, %v3272_v44  ;;  %1710 = vmatmul.f32.gmra.mxu3 %v1588_v23  ;;  %v3306_v0 = vadd.f32 1.0, %v1430_v51  ;;  %v3340_v23 = vld [vmem:[%s3530_s4] ss:$0 sm:$0xff] }
 0x1de   :  { %v1406_v15 = vmul.f32 %v1405_v53, %v3085_v56  ;;  %v827_v1 = vadd.f32 0.112945676, %v826_v42  ;;  %v1465_v35 = vadd.f32 0.014752088, %v1464_v5  ;;  %v1503_v59 = vadd.f32 0.001143296, %v1502_v30 }
 0x1df   :  { %v1573_v2 = vmul.f32 %v1541_v39, %v2884_v4  ;;  %v794_v62 = vsub.f32 1.0, %v793_v6  ;;  %v801_v14 = vand.u32 2147483647, %v3272_v44  ;;  %v803_v33 = vand.u32 2147483648, %v3272_v44 }
 0x1e0   :  { %v1790_v26 = vclamps-f32 %v1406_v15, 1.0  ;;  %1882 = vrcp.f32 %v3306_v0  ;;  %vm798_vm8 = vweird.f32 %v1881_v50  ;;  %v828_v56 = vmul.f32 %v827_v1, %v2933_v47 }
 0x1e1   :  { %1665 = vmatmul.f32.gmra.mxu1 %v1573_v2  ;;  %v795_v11 = vmul.f32 %v1881_v50, %v794_v62  ;;  %v1466_v3 = vmul.f32 %v1465_v35, %v2953_v55  ;;  %v1496_v63 = vadd.f32 0.05243302, %v1495_v8  ;;  %v865_v24 = vadd.f32 0.014752088, %v864_v16  ;;  %v3606_v16 = vld [vmem:[#allocation6_spill] sm:$0xff] }
 0x1e2   :  { %v1557_v4 = vadd.f32 1.0, %v1790_v26  ;;  %v1504_v61 = vmul.f32 %v1503_v59, %v3060_v18  ;;  %vm797_vm9 = vweird.f32 %v3272_v44  ;;  %v829_v29 = vadd.f32 0.4994258, %v828_v56  ;;  %v3607_v26 = vld [vmem:[#allocation11_spill] sm:$0xff] }
 0x1e3   :  { %v796_v43 = vadd.f32 %v1881_v50, %v795_v11  ;;  %v1467_v19 = vadd.f32 0.112945676, %v1466_v3  ;;  %vm799_vm10 = vmor %vm797_vm9, %vm798_vm8  ;;  %v804_v10 = vor.u32 1.1754944e-38, %v803_v33  ;;  %v866_v58 = vmul.f32 %v865_v24, %v2999_v52 }
 0x1e4   :  { %v1589_v38 = vmul.f32 %v1557_v4, %v3004_v34  ;;  %v1505_v40 = vadd.f32 0.014752088, %v1504_v61  ;;  %vm802_vm11 = vcmp.eq.f32.partialorder %v801_v14, 8.507059e+37  ;;  %v830_v37 = vmul.f32 %v829_v29, %v2933_v47  ;;  %v3608_v4 = vld [vmem:[#allocation7_spill] sm:$0xff] }
 0x1e5   :  { %v800_v27 = vsel %vm799_vm10, %v1881_v50, %v796_v43  ;;  %v1468_v13 = vmul.f32 %v1467_v19, %v2953_v55  ;;  %v819_v46 = vmul.f32 %v3209_v54, %v2933_v47  ;;  %v867_v25 = vadd.f32 0.112945676, %v866_v58  ;;  %v1630_v50 = vpop.f32.mrf.mxu1 }
 0x1e6   :  { %v1883_v17 = vpop.eup %1882  ;;  %1713 = vmatmul.f32.gmra.mxu3 %v1589_v38  ;;  %v805_v44 = vsel %vm802_vm11, %v804_v10, %v800_v27  ;;  %v1506_v34 = vmul.f32 %v1505_v40, %v3060_v18  ;;  %v1459_v7 = vmul.f32 %v3212_v36, %v2953_v55  ;;  %v3328_v12 = vadd.f32 1.0, %v830_v37 }
 0x1e7   :  { %v806_v60 = vmul.f32 %v805_v44, %v3093_v32  ;;  %v1433_v48 = vmul.f32 %v1883_v17, %v3306_v0  ;;  %v858_v45 = vadd.f32 0.18741608, %v3218_v22  ;;  %v1469_v57 = vadd.f32 0.4994258, %v1468_v13  ;;  %v3609_v13 = vld [vmem:[#allocation14_spill] sm:$0xff] }
 0x1e8   :  { %v868_v20 = vmul.f32 %v867_v25, %v2999_v52  ;;  %v1507_v47 = vadd.f32 0.112945676, %v1506_v34  ;;  %v1497_v54 = vmul.f32 %v1496_v63, %v3060_v18  ;;  %1884 = vrcp.f32 %v3328_v12 }
 0x1e9   :  { %v1775_v41 = vclamps-f32 %v806_v60, 1.0  ;;  %v1434_v42 = vsub.f32 1.0, %v1433_v48  ;;  %v1441_v36 = vand.u32 2147483647, %v3306_v0  ;;  %v1443_v32 = vand.u32 2147483648, %v3306_v0 }
 0x1ea   :  { %v1470_v49 = vmul.f32 %v1469_v57, %v2953_v55  ;;  %v869_v30 = vadd.f32 0.4994258, %v868_v20  ;;  %vm1438_vm12 = vweird.f32 %v1883_v17  ;;  %v1508_v31 = vmul.f32 %v1507_v47, %v3060_v18 }
 0x1eb   :  { %v1542_v21 = vadd.f32 1.0, %v1775_v41  ;;  %v1435_v22 = vmul.f32 %v1883_v17, %v1434_v42  ;;  %v859_v51 = vmul.f32 %v858_v45, %v2999_v52  ;;  %vm1437_vm13 = vweird.f32 %v3306_v0 }
 0x1ec   :  { %v3345_v5 = vadd.f32 1.0, %v1470_v49  ;;  %v870_v55 = vmul.f32 %v869_v30, %v2999_v52  ;;  %v1631_v53 = vadd.f32 %v3340_v23, %v1630_v50  ;;  %v1509_v6 = vadd.f32 0.4994258, %v1508_v31  ;;  %vm1439_vm14 = vmor %vm1437_vm13, %vm1438_vm12 }
 0x1ed   :  { %v1574_v8 = vmul.f32 %v1542_v21, %v3079_v9  ;;  %v1436_v39 = vadd.f32 %v1883_v17, %v1435_v22  ;;  %v820_v15 = vadd.f32 1.1283791, %v819_v46  ;;  %v1498_v1 = vadd.f32 0.18741608, %v1497_v54  ;;  %v1678_v9 = vpop.f32.mrf.mxu3  ;;  %v1633_v19 = vpop.f32.mrf.mxu1 }
 0x1ee   :  { %v1444_v35 = vor.u32 1.1754944e-38, %v1443_v32  ;;  %1886 = vrcp.f32 %v3345_v5  ;;  %v1885_v2 = vpop.eup %1884  ;;  %vm1442_vm15 = vcmp.eq.f32.partialorder %v1441_v36, 8.507059e+37  ;;  %v3351_v0 = vadd.f32 1.0, %v870_v55  ;;  %1726 = vst [vmem:[%s3531_s5] sm:$0xff] %v1631_v53 }
 0x1ef   :  { %1668 = vmatmul.f32.gmra.mxu1 %v1574_v8  ;;  %v1440_v62 = vsel %vm1439_vm14, %v1883_v17, %v1436_v39  ;;  %v1510_v52 = vmul.f32 %v1509_v6, %v3060_v18  ;;  %v214_v59 = vmul.f32 0.5, %v3606_v16  ;;  %v3359_v14 = vmul.f32 0.5, %v3607_v26  ;;  %v3610_v17 = vld [vmem:[#allocation15_spill] sm:$0xff] }
 0x1f0   :  { %v1445_v33 = vsel %vm1442_vm15, %v1444_v35, %v1440_v62  ;;  %v833_v11 = vmul.f32 %v1885_v2, %v3328_v12  ;;  %v1460_v56 = vadd.f32 1.1283791, %v1459_v7  ;;  %v860_v3 = vadd.f32 1.1283791, %v859_v51 }
 0x1f1   :  { %v1446_v63 = vmul.f32 %v1445_v33, %v3097_v28  ;;  %1888 = vrcp.f32 %v3351_v0  ;;  %v821_v24 = vmul.f32 %v820_v15, %v3608_v4  ;;  %v1499_v61 = vmul.f32 %v1498_v1, %v3060_v18 }
 0x1f2   :  { %v834_v43 = vsub.f32 1.0, %v833_v11  ;;  %v3366_v29 = vadd.f32 1.0, %v1510_v52  ;;  %v843_v10 = vand.u32 2147483648, %v3328_v12  ;;  %v1634_v58 = vadd.f32 %v3340_v23, %v1633_v19 }
 0x1f3   :  { %v1791_v38 = vclamps-f32 %v1446_v63, 1.0  ;;  %v1679_v40 = vadd.f32 %v3340_v23, %v1678_v9  ;;  %vm838_vm0 = vweird.f32 %v1885_v2  ;;  %v841_v28 = vand.u32 2147483647, %v3328_v12 }
 0x1f4   :  { %v1887_v27 = vpop.eup %1886  ;;  %v835_v37 = vmul.f32 %v1885_v2, %v834_v43  ;;  %1890 = vrcp.f32 %v3366_v29  ;;  %v1461_v18 = vmul.f32 %v1460_v56, %v3609_v13  ;;  %v3375_v46 = vmul.f32 %v860_v3, %v3610_v17  ;;  %1727 = vst [vmem:[%s3531_s5 + $0x8] sm:$0xff] %v1634_v58  ;;  %v3614_v43 = vld [vmem:[#allocation16_spill] sm:$0xff] }
 0x1f5   :  { %v1558_v44 = vadd.f32 1.0, %v1791_v38  ;;  %v1473_v25 = vmul.f32 %v1887_v27, %v3345_v5  ;;  %v1500_v34 = vadd.f32 1.1283791, %v1499_v61  ;;  %vm837_vm1 = vweird.f32 %v3328_v12  ;;  %1742 = vst [vmem:[%s3531_s5 + $0x80] sm:$0xff] %v1679_v40  ;;  %v1681_v54 = vpop.f32.mrf.mxu3  ;;  %v1636_v31 = vpop.f32.mrf.mxu1 }
 0x1f6   :  { %v836_v7 = vadd.f32 %v1885_v2, %v835_v37  ;;  %v1481_v60 = vand.u32 2147483647, %v3345_v5  ;;  %vm839_vm2 = vmor %vm837_vm1, %vm838_vm0  ;;  %v844_v57 = vor.u32 1.1754944e-38, %v843_v10  ;;  %v1483_v47 = vand.u32 2147483648, %v3345_v5 }
 0x1f7   :  { %v1889_v48 = vpop.eup %1888  ;;  %v1590_v45 = vmul.f32 %v1558_v44, %v214_v59  ;;  %v1474_v20 = vsub.f32 1.0, %v1473_v25  ;;  %vm842_vm3 = vcmp.eq.f32.partialorder %v841_v28, 8.507059e+37  ;;  %v883_v12 = vand.u32 2147483648, %v3351_v0 }
 0x1f8   :  { %v840_v41 = vsel %vm839_vm2, %v1885_v2, %v836_v7  ;;  %v873_v42 = vmul.f32 %v1889_v48, %v3351_v0  ;;  %vm1478_vm4 = vweird.f32 %v1887_v27  ;;  %v1682_v49 = vadd.f32 %v3340_v23, %v1681_v54 }
 0x1f9   :  { %1716 = vmatmul.f32.gmra.mxu3 %v1590_v45  ;;  %v845_v36 = vsel %vm842_vm3, %v844_v57, %v840_v41  ;;  %v1475_v32 = vmul.f32 %v1887_v27, %v1474_v20  ;;  %vm1477_vm5 = vweird.f32 %v3345_v5  ;;  %vm3392_vm6 = vcmp.eq.f32.partialorder %v1481_v60, 8.507059e+37  ;;  %v3616_v60 = vld [vmem:[#allocation10_spill] sm:$0xff] }
 0x1fa   :  { %v1891_v30 = vpop.eup %1890  ;;  %v846_v50 = vmul.f32 %v845_v36, %v821_v24  ;;  %v874_v22 = vsub.f32 1.0, %v873_v42  ;;  %v1484_v55 = vor.u32 1.1754944e-38, %v1483_v47  ;;  %v1637_v39 = vadd.f32 %v3340_v23, %v1636_v31  ;;  %1743 = vst [vmem:[%s3531_s5 + $0x88] sm:$0xff] %v1682_v49  ;;  %vm1479_vm7 = vmor %vm1477_vm5, %vm1478_vm4  ;;  %v3613_v24 = vld [vmem:[#allocation8_spill] sm:$0xff] }
 0x1fb   :  { %v1476_v51 = vadd.f32 %v1887_v27, %v1475_v32  ;;  %v1513_v8 = vmul.f32 %v1891_v30, %v3366_v29  ;;  %vm878_vm8 = vweird.f32 %v1889_v48  ;;  %v881_v5 = vand.u32 2147483647, %v3351_v0 }
 0x1fc   :  { %v1776_v53 = vclamps-f32 %v846_v50, 1.0  ;;  %v875_v6 = vmul.f32 %v1889_v48, %v874_v22  ;;  %vm877_vm9 = vweird.f32 %v3351_v0  ;;  %v884_v1 = vor.u32 1.1754944e-38, %v883_v12  ;;  %1728 = vst [vmem:[%s3531_s5 + $0x10] sm:$0xff] %v1637_v39 }
 0x1fd   :  { %v1480_v15 = vsel %vm1479_vm7, %v1887_v27, %v1476_v51  ;;  %v1514_v35 = vsub.f32 1.0, %v1513_v8  ;;  %v1523_v9 = vand.u32 2147483648, %v3366_v29  ;;  %vm879_vm10 = vmor %vm877_vm9, %vm878_vm8  ;;  %vm1518_vm11 = vweird.f32 %v1891_v30  ;;  %v1684_v0 = vpop.f32.mrf.mxu3 }
 0x1fe   :  { %v1543_v2 = vadd.f32 1.0, %v1776_v53  ;;  %v1485_v62 = vsel %vm3392_vm6, %v1484_v55, %v1480_v15  ;;  %v876_v52 = vadd.f32 %v1889_v48, %v875_v6  ;;  %v1521_v26 = vand.u32 2147483647, %v3366_v29 }
 0x1ff   :  { %v1486_v16 = vmul.f32 %v1485_v62, %v1461_v18  ;;  %v1515_v59 = vmul.f32 %v1891_v30, %v1514_v35  ;;  %vm882_vm12 = vcmp.eq.f32.partialorder %v881_v5, 8.507059e+37  ;;  %v1685_v56 = vadd.f32 %v3340_v23, %v1684_v0  ;;  %v3615_v18 = vld [vmem:[#allocation9_spill] sm:$0xff] }
 0x200   :  { %v1575_v33 = vmul.f32 %v1543_v2, %v3359_v14  ;;  %v880_v11 = vsel %vm879_vm10, %v1889_v48, %v876_v52  ;;  %vm1517_vm13 = vweird.f32 %v3366_v29  ;;  %v215_v61 = vmul.f32 0.5, %v3613_v24  ;;  %v1639_v14 = vpop.f32.mrf.mxu1 }
 0x201   :  { %v1792_v3 = vclamps-f32 %v1486_v16, 1.0  ;;  %v885_v63 = vsel %vm882_vm12, %v884_v1, %v880_v11  ;;  %v1516_v4 = vadd.f32 %v1891_v30, %v1515_v59  ;;  %v1501_v19 = vmul.f32 %v1500_v34, %v3614_v43  ;;  %vm1519_vm14 = vmor %vm1517_vm13, %vm1518_vm11  ;;  %1744 = vst [vmem:[%s3531_s5 + $0x90] sm:$0xff] %v1685_v56 }
 0x202   :  { %1671 = vmatmul.f32.gmra.mxu1 %v1575_v33  ;;  %v886_v38 = vmul.f32 %v885_v63, %v3375_v46  ;;  %v1524_v10 = vor.u32 1.1754944e-38, %v1523_v9  ;;  %vm1522_vm15 = vcmp.eq.f32.partialorder %v1521_v26, 8.507059e+37  ;;  %v1640_v29 = vadd.f32 %v3340_v23, %v1639_v14 }
 0x203   :  { %v1559_v58 = vadd.f32 1.0, %v1792_v3  ;;  %v1520_v40 = vsel %vm1519_vm14, %v1891_v30, %v1516_v4  ;;  %v200_v17 = vmul.f32 0.5, %v3615_v18  ;;  %v216_v48 = vmul.f32 0.5, %v3616_v60 }
 0x204   :  { %v1777_v27 = vclamps-f32 %v886_v38, 1.0  ;;  %v1525_v37 = vsel %vm1522_vm15, %v1524_v10, %v1520_v40  ;;  %1729 = vst [vmem:[%s3531_s5 + $0x18] sm:$0xff] %v1640_v29 }
 0x205   :  { %v1591_v28 = vmul.f32 %v1559_v58, %v215_v61  ;;  %v1526_v13 = vmul.f32 %v1525_v37, %v1501_v19  ;;  %v1687_v25 = vpop.f32.mrf.mxu3 }
 0x206   :  { %v1544_v46 = vadd.f32 1.0, %v1777_v27  ;;  %v1688_v7 = vadd.f32 %v3340_v23, %v1687_v25 }
 0x207   :  { %1719 = vmatmul.f32.gmra.mxu3 %v1591_v28  ;;  %v1793_v44 = vclamps-f32 %v1526_v13, 1.0 }
 0x208   :  { %v1576_v34 = vmul.f32 %v1544_v46, %v200_v17  ;;  %v1642_v57 = vpop.f32.mrf.mxu1  ;;  %1745 = vst [vmem:[%s3531_s5 + $0x98] sm:$0xff] %v1688_v7 }
 0x209   :  { %v1560_v45 = vadd.f32 1.0, %v1793_v44  ;;  %v1643_v47 = vadd.f32 %v3340_v23, %v1642_v57 }
 0x20a   :  { %1674 = vmatmul.f32.gmra.mxu1 %v1576_v34 }
 0x20b   :  { %v1592_v20 = vmul.f32 %v1560_v45, %v216_v48  ;;  %1730 = vst [vmem:[%s3531_s5 + $0x20] sm:$0xff] %v1643_v47 }
 0x20d   :  { %v1690_v54 = vpop.f32.mrf.mxu3 }
 0x20e   :  { %v1691_v41 = vadd.f32 %v3340_v23, %v1690_v54 }
 0x20f   :  { %1722 = vmatmul.f32.gmra.mxu3 %v1592_v20 }
 0x210   :  { %v1645_v42 = vpop.f32.mrf.mxu1  ;;  %1746 = vst [vmem:[%s3531_s5 + $0xa0] sm:$0xff] %v1691_v41 }
 0x211   :  { %v1646_v12 = vadd.f32 %v3340_v23, %v1645_v42 }
 0x213   :  { %1731 = vst [vmem:[%s3531_s5 + $0x28] sm:$0xff] %v1646_v12 }
 0x215   :  { %v1693_v36 = vpop.f32.mrf.mxu3 }
 0x216   :  { %v1694_v32 = vadd.f32 %v3340_v23, %v1693_v36 }
 0x218   :  { %v1648_v49 = vpop.f32.mrf.mxu1  ;;  %1747 = vst [vmem:[%s3531_s5 + $0xa8] sm:$0xff] %v1694_v32 }
 0x219   :  { %v1649_v30 = vadd.f32 %v3340_v23, %v1648_v49 }
 0x21b   :  { %1732 = vst [vmem:[%s3531_s5 + $0x30] sm:$0xff] %v1649_v30 }
 0x21d   :  { %v1696_v50 = vpop.f32.mrf.mxu3 }
 0x21e   :  { %v1697_v21 = vadd.f32 %v3340_v23, %v1696_v50 }
 0x220   :  { %v1651_v22 = vpop.f32.mrf.mxu1  ;;  %1748 = vst [vmem:[%s3531_s5 + $0xb0] sm:$0xff] %v1697_v21 }
 0x221   :  { %v1652_v31 = vadd.f32 %v3340_v23, %v1651_v22 }
 0x223   :  { %1733 = vst [vmem:[%s3531_s5 + $0x38] sm:$0xff] %v1652_v31 }
 0x225   :  { %v1699_v51 = vpop.f32.mrf.mxu3 }
 0x226   :  { %v1700_v55 = vadd.f32 %v3340_v23, %v1699_v51 }
 0x228   :  { %v1654_v8 = vpop.f32.mrf.mxu1  ;;  %1749 = vst [vmem:[%s3531_s5 + $0xb8] sm:$0xff] %v1700_v55 }
 0x229   :  { %v1655_v39 = vadd.f32 %v3340_v23, %v1654_v8 }
 0x22b   :  { %1734 = vst [vmem:[%s3531_s5 + $0x40] sm:$0xff] %v1655_v39 }
 0x22d   :  { %v1702_v53 = vpop.f32.mrf.mxu3 }
 0x22e   :  { %v1703_v6 = vadd.f32 %v3340_v23, %v1702_v53 }
 0x230   :  { %1750 = vst [vmem:[%s3531_s5 + $0xc0] sm:$0xff] %v1703_v6 }
 0x239   :  { %v1657_v5 = vpop.f32.mrf.mxu1 }
 0x23a   :  { %v1658_v15 = vadd.f32 %v3340_v23, %v1657_v5 }
 0x23c   :  { %1735 = vst [vmem:[%s3531_s5 + $0x48] sm:$0xff] %v1658_v15 }
 0x242   :  { %v1660_v1 = vpop.f32.mrf.mxu1 }
 0x243   :  { %v1661_v35 = vadd.f32 %v3340_v23, %v1660_v1 }
 0x245   :  { %1736 = vst [vmem:[%s3531_s5 + $0x50] sm:$0xff] %v1661_v35  ;;  %v1705_v2 = vpop.f32.mrf.mxu3 }
 0x246   :  { %v1706_v62 = vadd.f32 %v3340_v23, %v1705_v2 }
 0x248   :  { %1751 = vst [vmem:[%s3531_s5 + $0xc8] sm:$0xff] %v1706_v62 }
 0x24f   :  { %v1708_v52 = vpop.f32.mrf.mxu3 }
 0x250   :  { %v1709_v9 = vadd.f32 %v3340_v23, %v1708_v52 }
 0x252   :  { %1752 = vst [vmem:[%s3531_s5 + $0xd0] sm:$0xff] %v1709_v9 }
 0x255   :  { %v1663_v16 = vpop.f32.mrf.mxu1 }
 0x256   :  { %v1664_v59 = vadd.f32 %v3340_v23, %v1663_v16 }
 0x258   :  { %1737 = vst [vmem:[%s3531_s5 + $0x58] sm:$0xff] %v1664_v59 }
 0x25e   :  { %v1666_v26 = vpop.f32.mrf.mxu1 }
 0x25f   :  { %v1667_v0 = vadd.f32 %v3340_v23, %v1666_v26 }
 0x260   :  { %v1711_v33 = vpop.f32.mrf.mxu3 }
 0x261   :  { %1738 = vst [vmem:[%s3531_s5 + $0x60] sm:$0xff] %v1667_v0  ;;  %v1712_v11 = vadd.f32 %v3340_v23, %v1711_v33 }
 0x263   :  { %1753 = vst [vmem:[%s3531_s5 + $0xd8] sm:$0xff] %v1712_v11 }
 0x269   :  { %v1714_v56 = vpop.f32.mrf.mxu3 }
 0x26a   :  { %v1715_v3 = vadd.f32 %v3340_v23, %v1714_v56 }
 0x26c   :  { %v1669_v63 = vpop.f32.mrf.mxu1  ;;  %1754 = vst [vmem:[%s3531_s5 + $0xe0] sm:$0xff] %v1715_v3 }
 0x26d   :  { %v1670_v4 = vadd.f32 %v3340_v23, %v1669_v63 }
 0x26f   :  { %1739 = vst [vmem:[%s3531_s5 + $0x68] sm:$0xff] %v1670_v4 }
 0x27c   :  { %v1717_v24 = vpop.f32.mrf.mxu3 }
 0x27d   :  { %v1718_v61 = vadd.f32 %v3340_v23, %v1717_v24 }
 0x27f   :  { %v1672_v43 = vpop.f32.mrf.mxu1  ;;  %1755 = vst [vmem:[%s3531_s5 + $0xe8] sm:$0xff] %v1718_v61 }
 0x280   :  { %v1673_v19 = vadd.f32 %v3340_v23, %v1672_v43 }
 0x282   :  { %1740 = vst [vmem:[%s3531_s5 + $0x70] sm:$0xff] %v1673_v19 }
 0x287   :  { %v1675_v38 = vpop.f32.mrf.mxu1 }
 0x288   :  { %v1676_v10 = vadd.f32 %v3340_v23, %v1675_v38 }
 0x28a   :  { %1741 = vst [vmem:[%s3531_s5 + $0x78] sm:$0xff] %v1676_v10  ;;  %v1720_v14 = vpop.f32.mrf.mxu3 }
 0x28b   :  { %v1721_v58 = vadd.f32 %v3340_v23, %v1720_v14 }
 0x28d   :  { %1756 = vst [vmem:[%s3531_s5 + $0xf0] sm:$0xff] %v1721_v58 }
 0x292   :  { %v1723_v40 = vpop.f32.mrf.mxu3 }
 0x293   :  { %v1724_v29 = vadd.f32 %v3340_v23, %v1723_v40 }
 0x295   :  { %1757 = vst [vmem:[%s3531_s5 + $0xf8] sm:$0xff] %v1724_v29 }

</bundles_post_ra>
